<compile_context>
chip_gen: v7x
topology: tpu7x:2x2x1
jax: 0.10.0
libtpu: 0.0.40
codegen_flags: <defaults>
</compile_context>

<pallas_src>
import jax
import jax.numpy as jnp
from jax.experimental import pallas as pl
from jax.experimental.pallas import tpu as pltpu


# ----------------------------------------------------------------------------
# Pallas kernels
# ----------------------------------------------------------------------------
def _conv_relu_pool_kernel(p00_ref, p01_ref, p10_ref, p11_ref, w_ref, b_ref,
                           o_ref):
    """Fused conv (as 4 pooling-tap matmuls) + bias + ReLU + 2x2 max-pool.

    p*_ref : (R, K) im2col patch matrix of one image for one pooling tap,
             R = pooled_H * pooled_W, K = kh * kw * C_in.
    w_ref  : (K, C_out)   b_ref: (1, C_out)   o_ref: (R, C_out)
    """
    w = w_ref[...]
    z00 = jnp.dot(p00_ref[...], w, preferred_element_type=jnp.float32)
    z01 = jnp.dot(p01_ref[...], w, preferred_element_type=jnp.float32)
    z10 = jnp.dot(p10_ref[...], w, preferred_element_type=jnp.float32)
    z11 = jnp.dot(p11_ref[...], w, preferred_element_type=jnp.float32)
    # Max-pool over the 4 taps.  Bias is tap-independent and ReLU is monotone,
    # so relu(max_t(z_t) + b) == maxpool(relu(conv + b)).
    z = jnp.maximum(jnp.maximum(z00, z01), jnp.maximum(z10, z11))
    o_ref[...] = jnp.maximum(z + b_ref[...], 0.0).astype(o_ref.dtype)


def _tail_kernel(x_ref, w5_ref, b5_ref, w6_ref, b6_ref, w7_ref, b7_ref, o_ref):
    """Fused c5 (5x5 conv -> 1x1 spatial == matmul) + f6 + f7 + row softmax."""
    h = jnp.dot(x_ref[...], w5_ref[...], preferred_element_type=jnp.float32)
    h = jnp.maximum(h + b5_ref[...], 0.0)
    h = jnp.dot(h, w6_ref[...], preferred_element_type=jnp.float32)
    h = jnp.maximum(h + b6_ref[...], 0.0)
    z = jnp.dot(h, w7_ref[...], preferred_element_type=jnp.float32)
    z = z + b7_ref[...]
    m = jnp.max(z, axis=-1, keepdims=True)
    e = jnp.exp(z - m)
    o_ref[...] = (e / jnp.sum(e, axis=-1, keepdims=True)).astype(o_ref.dtype)


# ----------------------------------------------------------------------------
# Glue: pooling-tap im2col patch matrices (channels-last, K order = (i, j, c),
# matching weight.transpose(2, 3, 1, 0).reshape(K, C_out)).
# ----------------------------------------------------------------------------
def _pool_tap_patches(x, kh, kw):
    """x: (B, H, W, C) NHWC -> 4 patch matrices, one per 2x2-pool tap.

    Tap order: (dy, dx) in [(0,0), (0,1), (1,0), (1,1)].
    Each patch matrix has shape (B, Hp*Wp, kh*kw*C) where Hp = (H-kh+1)//2.
    """
    B, H, W, C = x.shape
    Ho, Wo = H - kh + 1, W - kw + 1
    Hp, Wp = Ho // 2, Wo // 2
    taps = []
    for dy in (0, 1):
        for dx in (0, 1):
            pieces = []
            for i in range(kh):
                for j in range(kw):
                    pieces.append(
                        x[:, dy + i:dy + i + 2 * Hp - 1:2,
                             dx + j:dx + j + 2 * Wp - 1:2, :])  # (B,Hp,Wp,C)
            p = jnp.stack(pieces, axis=3)            # (B, Hp, Wp, kh*kw, C)
            taps.append(p.reshape(B, Hp * Wp, kh * kw * C))
    return taps, (Hp, Wp)


def conv_relu_pool(x, w, b):
    """Fused Conv2d(valid, stride 1) + ReLU + MaxPool2d(2, 2).

    x: (B, H, W, C_in) NHWC, w: (C_out, C_in, kh, kw) [PyTorch layout],
    b: (C_out,).  Returns (B, Hp, Wp, C_out) NHWC.
    """
    C_out, C_in, kh, kw = w.shape
    B = x.shape[0]
    taps, (Hp, Wp) = _pool_tap_patches(x, kh, kw)
    R, K = Hp * Wp, kh * kw * C_in
    w2 = jnp.transpose(w, (2, 3, 1, 0)).reshape(K, C_out).astype(jnp.float32)
    b2 = b.reshape(1, C_out).astype(jnp.float32)

    # Grid over the batch axis (one image per step; blocks are full spatial
    # tiles, so per-step VMEM is O(100 KB) at any batch size).
    patch_spec = pl.BlockSpec((None, R, K), lambda n: (n, 0, 0))
    out = pl.pallas_call(
        _conv_relu_pool_kernel,
        out_shape=jax.ShapeDtypeStruct((B, R, C_out), jnp.float32),
        grid=(B,),
        in_specs=[patch_spec, patch_spec, patch_spec, patch_spec,
                  pl.BlockSpec((K, C_out), lambda n: (0, 0)),
                  pl.BlockSpec((1, C_out), lambda n: (0, 0))],
        out_specs=pl.BlockSpec((None, R, C_out), lambda n: (n, 0, 0)),
        compiler_params=pltpu.CompilerParams(
            dimension_semantics=("parallel",)),
    )(*[t.astype(jnp.float32) for t in taps], w2, b2)
    return out.reshape(B, Hp, Wp, C_out)


def tail_fc_softmax(x, w5, b5, w6, b6, w7, b7):
    """Fused c5 + f6 + f7 + softmax.  x: (B, 400) flattened S4 output (NHWC
    order, i.e. K index = (i*5 + j)*16 + c)."""
    B, K = x.shape
    n_out = w7.shape[1]
    tm = min(B, 256)                     # full batch if small, else 256 rows
    out = pl.pallas_call(
        _tail_kernel,
        out_shape=jax.ShapeDtypeStruct((B, n_out), jnp.float32),
        grid=(pl.cdiv(B, tm),),
        in_specs=[pl.BlockSpec((tm, K), lambda i: (i, 0)),
                  pl.BlockSpec(w5.shape, lambda i: (0, 0)),
                  pl.BlockSpec(b5.shape, lambda i: (0, 0)),
                  pl.BlockSpec(w6.shape, lambda i: (0, 0)),
                  pl.BlockSpec(b6.shape, lambda i: (0, 0)),
                  pl.BlockSpec(w7.shape, lambda i: (0, 0)),
                  pl.BlockSpec(b7.shape, lambda i: (0, 0))],
        out_specs=pl.BlockSpec((tm, n_out), lambda i: (i, 0)),
        compiler_params=pltpu.CompilerParams(
            dimension_semantics=("parallel",)),
    )(x.astype(jnp.float32), w5, b5, w6, b6, w7, b7)
    return out


# ----------------------------------------------------------------------------
# Parameters (deterministic, PyTorch-shaped)
# ----------------------------------------------------------------------------
def init_params(key):
    def uniform(k, shape, fan_in):
        bound = 1.0 / jnp.sqrt(jnp.asarray(fan_in, jnp.float32))
        return jax.random.uniform(k, shape, jnp.float32, -bound, bound)

    ks = jax.random.split(key, 10)
    return {
        "c1_w": uniform(ks[0], (6, 1, 5, 5), 1 * 5 * 5),
        "c1_b": uniform(ks[1], (6,), 1 * 5 * 5),
        "c3_w": uniform(ks[2], (16, 6, 5, 5), 6 * 5 * 5),
        "c3_b": uniform(ks[3], (16,), 6 * 5 * 5),
        "c5_w": uniform(ks[4], (120, 16, 5, 5), 16 * 5 * 5),
        "c5_b": uniform(ks[5], (120,), 16 * 5 * 5),
        "f6_w": uniform(ks[6], (84, 120), 120),
        "f6_b": uniform(ks[7], (84,), 120),
        "f7_w": uniform(ks[8], (10, 84), 84),
        "f7_b": uniform(ks[9], (10,), 84),
    }


# ----------------------------------------------------------------------------
# Forward pass (matches LeNet5.forward)
# ----------------------------------------------------------------------------
@jax.jit
def lenet5_forward(params, img):
    """img: (B, 1, 32, 32) NCHW float32 -> softmax probabilities (B, 10)."""
    B = img.shape[0]
    x = jnp.transpose(img, (0, 2, 3, 1))                      # NHWC, once
    x = conv_relu_pool(x, params["c1_w"], params["c1_b"])     # (B, 14, 14, 6)
    x = conv_relu_pool(x, params["c3_w"], params["c3_b"])     # (B, 5, 5, 16)
    x = x.reshape(B, 5 * 5 * 16)                              # (B, 400)

    w5 = jnp.transpose(params["c5_w"], (2, 3, 1, 0)).reshape(400, 120)
    b5 = params["c5_b"].reshape(1, 120)
    w6 = params["f6_w"].T                                     # (120, 84)
    b6 = params["f6_b"].reshape(1, 84)
    w7 = params["f7_w"].T                                     # (84, 10)
    b7 = params["f7_b"].reshape(1, 10)
    return tail_fc_softmax(
        x, w5.astype(jnp.float32), b5.astype(jnp.float32),
        w6.astype(jnp.float32), b6.astype(jnp.float32),
        w7.astype(jnp.float32), b7.astype(jnp.float32))


# ----------------------------------------------------------------------------
# Pure-XLA reference (no Pallas) for numerical validation
# ----------------------------------------------------------------------------
def lenet5_reference(params, img):
    def conv(x, w, b):
        y = jax.lax.conv_general_dilated(
            x, w, window_strides=(1, 1), padding="VALID",
            dimension_numbers=("NCHW", "OIHW", "NCHW"))
        return jax.nn.relu(y + b.reshape(1, -1, 1, 1))

    def pool(x):
        return jax.lax.reduce_window(x, -jnp.inf, jax.lax.max,
                                     (1, 1, 2, 2), (1, 1, 2, 2), "VALID")

    x = pool(conv(img, params["c1_w"], params["c1_b"]))
    x = pool(conv(x, params["c3_w"], params["c3_b"]))
    x = conv(x, params["c5_w"], params["c5_b"])
    x = x.reshape(-1, 120)
    x = jax.nn.relu(x @ params["f6_w"].T + params["f6_b"])
    x = x @ params["f7_w"].T + params["f7_b"]
    return jax.nn.softmax(x, axis=-1)


if __name__ == "__main__":
    key = jax.random.PRNGKey(0)
    k_params, k_input = jax.random.split(key)
    params = init_params(k_params)

    # LeNet-5 requires 1x32x32 inputs; use a small batch of 2.
    x = jax.random.normal(k_input, (2, 1, 32, 32), dtype=jnp.float32)

    out = lenet5_forward(params, x)
    out = jax.block_until_ready(out)

    assert out.shape == (2, 10), out.shape
    assert out.dtype == jnp.float32
    assert bool(jnp.allclose(jnp.sum(out, axis=-1), 1.0, atol=1e-5))

    ref = lenet5_reference(params, x)
    assert bool(jnp.allclose(out, ref, atol=1e-4, rtol=1e-3)), (
        "max abs diff vs XLA reference: "
        + str(float(jnp.max(jnp.abs(out - ref)))))

    print("KERNEL_OK")
</pallas_src>

<mosaic_0001>
module attributes {stable_mosaic.version = 11 : i64} {
  func.func @_conv_relu_pool_kernel(%arg0: i32, %arg1: memref<1x196x25xf32, #tpu.memory_space<vmem>>, %arg2: memref<1x196x25xf32, #tpu.memory_space<vmem>>, %arg3: memref<1x196x25xf32, #tpu.memory_space<vmem>>, %arg4: memref<1x196x25xf32, #tpu.memory_space<vmem>>, %arg5: memref<25x6xf32, #tpu.memory_space<vmem>>, %arg6: memref<1x6xf32, #tpu.memory_space<vmem>>, %arg7: memref<1x196x6xf32, #tpu.memory_space<vmem>>) attributes {dimension_semantics = [#tpu.dimension_semantics<parallel>], iteration_bounds = array<i64: 2>, scalar_prefetch = 0 : i64, scratch_operands = 0 : i64, tpu.core_type = #tpu.core_type<tc>, window_params = [{transform_indices = @transform_0, window_bounds = array<i64: 1, 196, 25>}, {transform_indices = @transform_1, window_bounds = array<i64: 1, 196, 25>}, {transform_indices = @transform_2, window_bounds = array<i64: 1, 196, 25>}, {transform_indices = @transform_3, window_bounds = array<i64: 1, 196, 25>}, {pipeline_mode = #tpu.pipeline_mode<synchronous>, transform_indices = @transform_4, window_bounds = array<i64: 25, 6>}, {pipeline_mode = #tpu.pipeline_mode<synchronous>, transform_indices = @transform_5, window_bounds = array<i64: 1, 6>}, {transform_indices = @transform_6, window_bounds = array<i64: 1, 196, 6>}]} {
    %c0 = arith.constant 0 : index
    %c0_0 = arith.constant 0 : index
    %0 = vector.load %arg5[%c0, %c0_0] : memref<25x6xf32, #tpu.memory_space<vmem>>, vector<25x6xf32>
    %c0_1 = arith.constant 0 : index
    %c0_2 = arith.constant 0 : index
    %c0_3 = arith.constant 0 : index
    %1 = vector.load %arg1[%c0_1, %c0_2, %c0_3] : memref<1x196x25xf32, #tpu.memory_space<vmem>>, vector<1x196x25xf32>
    %2 = vector.shape_cast %1 : vector<1x196x25xf32> to vector<196x25xf32>
    %cst = arith.constant dense<0.000000e+00> : vector<196x6xf32>
    %3 = tpu.matmul %2, %0, %cst {dimension_numbers = #tpu.dot_dimension_numbers<[1], [0], [0], [1], [0, 0, 1, 1], [], []>} : vector<196x25xf32>, vector<25x6xf32>, vector<196x6xf32> -> vector<196x6xf32>
    %c0_4 = arith.constant 0 : index
    %c0_5 = arith.constant 0 : index
    %c0_6 = arith.constant 0 : index
    %4 = vector.load %arg2[%c0_4, %c0_5, %c0_6] : memref<1x196x25xf32, #tpu.memory_space<vmem>>, vector<1x196x25xf32>
    %5 = vector.shape_cast %4 : vector<1x196x25xf32> to vector<196x25xf32>
    %cst_7 = arith.constant dense<0.000000e+00> : vector<196x6xf32>
    %6 = tpu.matmul %5, %0, %cst_7 {dimension_numbers = #tpu.dot_dimension_numbers<[1], [0], [0], [1], [0, 0, 1, 1], [], []>} : vector<196x25xf32>, vector<25x6xf32>, vector<196x6xf32> -> vector<196x6xf32>
    %c0_8 = arith.constant 0 : index
    %c0_9 = arith.constant 0 : index
    %c0_10 = arith.constant 0 : index
    %7 = vector.load %arg3[%c0_8, %c0_9, %c0_10] : memref<1x196x25xf32, #tpu.memory_space<vmem>>, vector<1x196x25xf32>
    %8 = vector.shape_cast %7 : vector<1x196x25xf32> to vector<196x25xf32>
    %cst_11 = arith.constant dense<0.000000e+00> : vector<196x6xf32>
    %9 = tpu.matmul %8, %0, %cst_11 {dimension_numbers = #tpu.dot_dimension_numbers<[1], [0], [0], [1], [0, 0, 1, 1], [], []>} : vector<196x25xf32>, vector<25x6xf32>, vector<196x6xf32> -> vector<196x6xf32>
    %c0_12 = arith.constant 0 : index
    %c0_13 = arith.constant 0 : index
    %c0_14 = arith.constant 0 : index
    %10 = vector.load %arg4[%c0_12, %c0_13, %c0_14] : memref<1x196x25xf32, #tpu.memory_space<vmem>>, vector<1x196x25xf32>
    %11 = vector.shape_cast %10 : vector<1x196x25xf32> to vector<196x25xf32>
    %cst_15 = arith.constant dense<0.000000e+00> : vector<196x6xf32>
    %12 = tpu.matmul %11, %0, %cst_15 {dimension_numbers = #tpu.dot_dimension_numbers<[1], [0], [0], [1], [0, 0, 1, 1], [], []>} : vector<196x25xf32>, vector<25x6xf32>, vector<196x6xf32> -> vector<196x6xf32>
    %13 = arith.maximumf %3, %6 : vector<196x6xf32>
    %14 = arith.maximumf %9, %12 : vector<196x6xf32>
    %15 = arith.maximumf %13, %14 : vector<196x6xf32>
    %c0_16 = arith.constant 0 : index
    %c0_17 = arith.constant 0 : index
    %16 = vector.load %arg6[%c0_16, %c0_17] : memref<1x6xf32, #tpu.memory_space<vmem>>, vector<1x6xf32>
    %17 = vector.broadcast %16 : vector<1x6xf32> to vector<196x6xf32>
    %18 = arith.addf %15, %17 : vector<196x6xf32>
    %cst_18 = arith.constant 0.000000e+00 : f32
    %19 = vector.broadcast %cst_18 : f32 to vector<196x6xf32>
    %20 = arith.maximumf %18, %19 : vector<196x6xf32>
    %c0_19 = arith.constant 0 : index
    %c0_20 = arith.constant 0 : index
    %c0_21 = arith.constant 0 : index
    %21 = vector.load %arg7[%c0_19, %c0_20, %c0_21] : memref<1x196x6xf32, #tpu.memory_space<vmem>>, vector<1x196x6xf32>
    %22 = vector.shape_cast %21 : vector<1x196x6xf32> to vector<196x6xf32>
    %23 = vector.shape_cast %20 : vector<196x6xf32> to vector<1x196x6xf32>
    tpu.vector_store %arg7[%c0_19, %c0_20, %c0_21], %23 {strides = array<i32>} : memref<1x196x6xf32, #tpu.memory_space<vmem>>, vector<1x196x6xf32>,
    return
  }
  func.func @transform_0(%arg0: i32) -> (i32, i32, i32) {
    %c0_i32 = arith.constant 0 : i32
    %c0_i32_0 = arith.constant 0 : i32
    %c0_i32_1 = arith.constant 0 : i32
    return %arg0, %c0_i32, %c0_i32_0 : i32, i32, i32
  }
  func.func @transform_1(%arg0: i32) -> (i32, i32, i32) {
    %c0_i32 = arith.constant 0 : i32
    %c0_i32_0 = arith.constant 0 : i32
    %c0_i32_1 = arith.constant 0 : i32
    return %arg0, %c0_i32, %c0_i32_0 : i32, i32, i32
  }
  func.func @transform_2(%arg0: i32) -> (i32, i32, i32) {
    %c0_i32 = arith.constant 0 : i32
    %c0_i32_0 = arith.constant 0 : i32
    %c0_i32_1 = arith.constant 0 : i32
    return %arg0, %c0_i32, %c0_i32_0 : i32, i32, i32
  }
  func.func @transform_3(%arg0: i32) -> (i32, i32, i32) {
    %c0_i32 = arith.constant 0 : i32
    %c0_i32_0 = arith.constant 0 : i32
    %c0_i32_1 = arith.constant 0 : i32
    return %arg0, %c0_i32, %c0_i32_0 : i32, i32, i32
  }
  func.func @transform_4(%arg0: i32) -> (i32, i32) {
    %c0_i32 = arith.constant 0 : i32
    %c0_i32_0 = arith.constant 0 : i32
    %c0_i32_1 = arith.constant 0 : i32
    return %c0_i32, %c0_i32_0 : i32, i32
  }
  func.func @transform_5(%arg0: i32) -> (i32, i32) {
    %c0_i32 = arith.constant 0 : i32
    %c0_i32_0 = arith.constant 0 : i32
    %c0_i32_1 = arith.constant 0 : i32
    return %c0_i32, %c0_i32_0 : i32, i32
  }
  func.func @transform_6(%arg0: i32) -> (i32, i32, i32) {
    %c0_i32 = arith.constant 0 : i32
    %c0_i32_0 = arith.constant 0 : i32
    %c0_i32_1 = arith.constant 0 : i32
    return %arg0, %c0_i32, %c0_i32_0 : i32, i32, i32
  }
}

module attributes {stable_mosaic.version = 11 : i64} {
  func.func @_conv_relu_pool_kernel(%arg0: i32, %arg1: memref<1x25x150xf32, #tpu.memory_space<vmem>>, %arg2: memref<1x25x150xf32, #tpu.memory_space<vmem>>, %arg3: memref<1x25x150xf32, #tpu.memory_space<vmem>>, %arg4: memref<1x25x150xf32, #tpu.memory_space<vmem>>, %arg5: memref<150x16xf32, #tpu.memory_space<vmem>>, %arg6: memref<1x16xf32, #tpu.memory_space<vmem>>, %arg7: memref<1x25x16xf32, #tpu.memory_space<vmem>>) attributes {dimension_semantics = [#tpu.dimension_semantics<parallel>], iteration_bounds = array<i64: 2>, scalar_prefetch = 0 : i64, scratch_operands = 0 : i64, tpu.core_type = #tpu.core_type<tc>, window_params = [{transform_indices = @transform_0, window_bounds = array<i64: 1, 25, 150>}, {transform_indices = @transform_1, window_bounds = array<i64: 1, 25, 150>}, {transform_indices = @transform_2, window_bounds = array<i64: 1, 25, 150>}, {transform_indices = @transform_3, window_bounds = array<i64: 1, 25, 150>}, {pipeline_mode = #tpu.pipeline_mode<synchronous>, transform_indices = @transform_4, window_bounds = array<i64: 150, 16>}, {pipeline_mode = #tpu.pipeline_mode<synchronous>, transform_indices = @transform_5, window_bounds = array<i64: 1, 16>}, {transform_indices = @transform_6, window_bounds = array<i64: 1, 25, 16>}]} {
    %c0 = arith.constant 0 : index
    %c0_0 = arith.constant 0 : index
    %0 = vector.load %arg5[%c0, %c0_0] : memref<150x16xf32, #tpu.memory_space<vmem>>, vector<150x16xf32>
    %c0_1 = arith.constant 0 : index
    %c0_2 = arith.constant 0 : index
    %c0_3 = arith.constant 0 : index
    %1 = vector.load %arg1[%c0_1, %c0_2, %c0_3] : memref<1x25x150xf32, #tpu.memory_space<vmem>>, vector<1x25x150xf32>
    %2 = vector.shape_cast %1 : vector<1x25x150xf32> to vector<25x150xf32>
    %cst = arith.constant dense<0.000000e+00> : vector<25x16xf32>
    %3 = tpu.matmul %2, %0, %cst {dimension_numbers = #tpu.dot_dimension_numbers<[1], [0], [0], [1], [0, 0, 1, 1], [], []>} : vector<25x150xf32>, vector<150x16xf32>, vector<25x16xf32> -> vector<25x16xf32>
    %c0_4 = arith.constant 0 : index
    %c0_5 = arith.constant 0 : index
    %c0_6 = arith.constant 0 : index
    %4 = vector.load %arg2[%c0_4, %c0_5, %c0_6] : memref<1x25x150xf32, #tpu.memory_space<vmem>>, vector<1x25x150xf32>
    %5 = vector.shape_cast %4 : vector<1x25x150xf32> to vector<25x150xf32>
    %cst_7 = arith.constant dense<0.000000e+00> : vector<25x16xf32>
    %6 = tpu.matmul %5, %0, %cst_7 {dimension_numbers = #tpu.dot_dimension_numbers<[1], [0], [0], [1], [0, 0, 1, 1], [], []>} : vector<25x150xf32>, vector<150x16xf32>, vector<25x16xf32> -> vector<25x16xf32>
    %c0_8 = arith.constant 0 : index
    %c0_9 = arith.constant 0 : index
    %c0_10 = arith.constant 0 : index
    %7 = vector.load %arg3[%c0_8, %c0_9, %c0_10] : memref<1x25x150xf32, #tpu.memory_space<vmem>>, vector<1x25x150xf32>
    %8 = vector.shape_cast %7 : vector<1x25x150xf32> to vector<25x150xf32>
    %cst_11 = arith.constant dense<0.000000e+00> : vector<25x16xf32>
    %9 = tpu.matmul %8, %0, %cst_11 {dimension_numbers = #tpu.dot_dimension_numbers<[1], [0], [0], [1], [0, 0, 1, 1], [], []>} : vector<25x150xf32>, vector<150x16xf32>, vector<25x16xf32> -> vector<25x16xf32>
    %c0_12 = arith.constant 0 : index
    %c0_13 = arith.constant 0 : index
    %c0_14 = arith.constant 0 : index
    %10 = vector.load %arg4[%c0_12, %c0_13, %c0_14] : memref<1x25x150xf32, #tpu.memory_space<vmem>>, vector<1x25x150xf32>
    %11 = vector.shape_cast %10 : vector<1x25x150xf32> to vector<25x150xf32>
    %cst_15 = arith.constant dense<0.000000e+00> : vector<25x16xf32>
    %12 = tpu.matmul %11, %0, %cst_15 {dimension_numbers = #tpu.dot_dimension_numbers<[1], [0], [0], [1], [0, 0, 1, 1], [], []>} : vector<25x150xf32>, vector<150x16xf32>, vector<25x16xf32> -> vector<25x16xf32>
    %13 = arith.maximumf %3, %6 : vector<25x16xf32>
    %14 = arith.maximumf %9, %12 : vector<25x16xf32>
    %15 = arith.maximumf %13, %14 : vector<25x16xf32>
    %c0_16 = arith.constant 0 : index
    %c0_17 = arith.constant 0 : index
    %16 = vector.load %arg6[%c0_16, %c0_17] : memref<1x16xf32, #tpu.memory_space<vmem>>, vector<1x16xf32>
    %17 = vector.broadcast %16 : vector<1x16xf32> to vector<25x16xf32>
    %18 = arith.addf %15, %17 : vector<25x16xf32>
    %cst_18 = arith.constant 0.000000e+00 : f32
    %19 = vector.broadcast %cst_18 : f32 to vector<25x16xf32>
    %20 = arith.maximumf %18, %19 : vector<25x16xf32>
    %c0_19 = arith.constant 0 : index
    %c0_20 = arith.constant 0 : index
    %c0_21 = arith.constant 0 : index
    %21 = vector.load %arg7[%c0_19, %c0_20, %c0_21] : memref<1x25x16xf32, #tpu.memory_space<vmem>>, vector<1x25x16xf32>
    %22 = vector.shape_cast %21 : vector<1x25x16xf32> to vector<25x16xf32>
    %23 = vector.shape_cast %20 : vector<25x16xf32> to vector<1x25x16xf32>
    tpu.vector_store %arg7[%c0_19, %c0_20, %c0_21], %23 {strides = array<i32>} : memref<1x25x16xf32, #tpu.memory_space<vmem>>, vector<1x25x16xf32>,
    return
  }
  func.func @transform_0(%arg0: i32) -> (i32, i32, i32) {
    %c0_i32 = arith.constant 0 : i32
    %c0_i32_0 = arith.constant 0 : i32
    %c0_i32_1 = arith.constant 0 : i32
    return %arg0, %c0_i32, %c0_i32_0 : i32, i32, i32
  }
  func.func @transform_1(%arg0: i32) -> (i32, i32, i32) {
    %c0_i32 = arith.constant 0 : i32
    %c0_i32_0 = arith.constant 0 : i32
    %c0_i32_1 = arith.constant 0 : i32
    return %arg0, %c0_i32, %c0_i32_0 : i32, i32, i32
  }
  func.func @transform_2(%arg0: i32) -> (i32, i32, i32) {
    %c0_i32 = arith.constant 0 : i32
    %c0_i32_0 = arith.constant 0 : i32
    %c0_i32_1 = arith.constant 0 : i32
    return %arg0, %c0_i32, %c0_i32_0 : i32, i32, i32
  }
  func.func @transform_3(%arg0: i32) -> (i32, i32, i32) {
    %c0_i32 = arith.constant 0 : i32
    %c0_i32_0 = arith.constant 0 : i32
    %c0_i32_1 = arith.constant 0 : i32
    return %arg0, %c0_i32, %c0_i32_0 : i32, i32, i32
  }
  func.func @transform_4(%arg0: i32) -> (i32, i32) {
    %c0_i32 = arith.constant 0 : i32
    %c0_i32_0 = arith.constant 0 : i32
    %c0_i32_1 = arith.constant 0 : i32
    return %c0_i32, %c0_i32_0 : i32, i32
  }
  func.func @transform_5(%arg0: i32) -> (i32, i32) {
    %c0_i32 = arith.constant 0 : i32
    %c0_i32_0 = arith.constant 0 : i32
    %c0_i32_1 = arith.constant 0 : i32
    return %c0_i32, %c0_i32_0 : i32, i32
  }
  func.func @transform_6(%arg0: i32) -> (i32, i32, i32) {
    %c0_i32 = arith.constant 0 : i32
    %c0_i32_0 = arith.constant 0 : i32
    %c0_i32_1 = arith.constant 0 : i32
    return %arg0, %c0_i32, %c0_i32_0 : i32, i32, i32
  }
}

module attributes {stable_mosaic.version = 11 : i64} {
  func.func @_tail_kernel(%arg0: i32, %arg1: memref<2x400xf32, #tpu.memory_space<vmem>>, %arg2: memref<400x120xf32, #tpu.memory_space<vmem>>, %arg3: memref<1x120xf32, #tpu.memory_space<vmem>>, %arg4: memref<120x84xf32, #tpu.memory_space<vmem>>, %arg5: memref<1x84xf32, #tpu.memory_space<vmem>>, %arg6: memref<84x10xf32, #tpu.memory_space<vmem>>, %arg7: memref<1x10xf32, #tpu.memory_space<vmem>>, %arg8: memref<2x10xf32, #tpu.memory_space<vmem>>) attributes {dimension_semantics = [#tpu.dimension_semantics<parallel>], iteration_bounds = array<i64: 1>, scalar_prefetch = 0 : i64, scratch_operands = 0 : i64, tpu.core_type = #tpu.core_type<tc>, window_params = [{transform_indices = @transform_0, window_bounds = array<i64: 2, 400>}, {pipeline_mode = #tpu.pipeline_mode<synchronous>, transform_indices = @transform_1, window_bounds = array<i64: 400, 120>}, {pipeline_mode = #tpu.pipeline_mode<synchronous>, transform_indices = @transform_2, window_bounds = array<i64: 1, 120>}, {pipeline_mode = #tpu.pipeline_mode<synchronous>, transform_indices = @transform_3, window_bounds = array<i64: 120, 84>}, {pipeline_mode = #tpu.pipeline_mode<synchronous>, transform_indices = @transform_4, window_bounds = array<i64: 1, 84>}, {pipeline_mode = #tpu.pipeline_mode<synchronous>, transform_indices = @transform_5, window_bounds = array<i64: 84, 10>}, {pipeline_mode = #tpu.pipeline_mode<synchronous>, transform_indices = @transform_6, window_bounds = array<i64: 1, 10>}, {transform_indices = @transform_7, window_bounds = array<i64: 2, 10>}]} {
    %c0 = arith.constant 0 : index
    %c0_0 = arith.constant 0 : index
    %0 = vector.load %arg1[%c0, %c0_0] : memref<2x400xf32, #tpu.memory_space<vmem>>, vector<2x400xf32>
    %c0_1 = arith.constant 0 : index
    %c0_2 = arith.constant 0 : index
    %1 = vector.load %arg2[%c0_1, %c0_2] : memref<400x120xf32, #tpu.memory_space<vmem>>, vector<400x120xf32>
    %cst = arith.constant dense<0.000000e+00> : vector<2x120xf32>
    %2 = tpu.matmul %0, %1, %cst {dimension_numbers = #tpu.dot_dimension_numbers<[1], [0], [0], [1], [0, 0, 1, 1], [], []>} : vector<2x400xf32>, vector<400x120xf32>, vector<2x120xf32> -> vector<2x120xf32>
    %c0_3 = arith.constant 0 : index
    %c0_4 = arith.constant 0 : index
    %3 = vector.load %arg3[%c0_3, %c0_4] : memref<1x120xf32, #tpu.memory_space<vmem>>, vector<1x120xf32>
    %4 = vector.broadcast %3 : vector<1x120xf32> to vector<2x120xf32>
    %5 = arith.addf %2, %4 : vector<2x120xf32>
    %cst_5 = arith.constant 0.000000e+00 : f32
    %6 = vector.broadcast %cst_5 : f32 to vector<2x120xf32>
    %7 = arith.maximumf %5, %6 : vector<2x120xf32>
    %c0_6 = arith.constant 0 : index
    %c0_7 = arith.constant 0 : index
    %8 = vector.load %arg4[%c0_6, %c0_7] : memref<120x84xf32, #tpu.memory_space<vmem>>, vector<120x84xf32>
    %cst_8 = arith.constant dense<0.000000e+00> : vector<2x84xf32>
    %9 = tpu.matmul %7, %8, %cst_8 {dimension_numbers = #tpu.dot_dimension_numbers<[1], [0], [0], [1], [0, 0, 1, 1], [], []>} : vector<2x120xf32>, vector<120x84xf32>, vector<2x84xf32> -> vector<2x84xf32>
    %c0_9 = arith.constant 0 : index
    %c0_10 = arith.constant 0 : index
    %10 = vector.load %arg5[%c0_9, %c0_10] : memref<1x84xf32, #tpu.memory_space<vmem>>, vector<1x84xf32>
    %11 = vector.broadcast %10 : vector<1x84xf32> to vector<2x84xf32>
    %12 = arith.addf %9, %11 : vector<2x84xf32>
    %cst_11 = arith.constant 0.000000e+00 : f32
    %13 = vector.broadcast %cst_11 : f32 to vector<2x84xf32>
    %14 = arith.maximumf %12, %13 : vector<2x84xf32>
    %c0_12 = arith.constant 0 : index
    %c0_13 = arith.constant 0 : index
    %15 = vector.load %arg6[%c0_12, %c0_13] : memref<84x10xf32, #tpu.memory_space<vmem>>, vector<84x10xf32>
    %cst_14 = arith.constant dense<0.000000e+00> : vector<2x10xf32>
    %16 = tpu.matmul %14, %15, %cst_14 {dimension_numbers = #tpu.dot_dimension_numbers<[1], [0], [0], [1], [0, 0, 1, 1], [], []>} : vector<2x84xf32>, vector<84x10xf32>, vector<2x10xf32> -> vector<2x10xf32>
    %c0_15 = arith.constant 0 : index
    %c0_16 = arith.constant 0 : index
    %17 = vector.load %arg7[%c0_15, %c0_16] : memref<1x10xf32, #tpu.memory_space<vmem>>, vector<1x10xf32>
    %18 = vector.broadcast %17 : vector<1x10xf32> to vector<2x10xf32>
    %19 = arith.addf %16, %18 : vector<2x10xf32>
    %cst_17 = arith.constant dense<0xFF800000> : vector<2xf32>
    %20 = vector.multi_reduction <maximumf>, %19, %cst_17 [1] : vector<2x10xf32> to vector<2xf32>
    %21 = vector.shape_cast %20 : vector<2xf32> to vector<2x1xf32>
    %22 = vector.broadcast %21 : vector<2x1xf32> to vector<2x10xf32>
    %23 = arith.subf %19, %22 : vector<2x10xf32>
    %24 = math.exp %23 : vector<2x10xf32>
    %cst_18 = arith.constant dense<0.000000e+00> : vector<2xf32>
    %25 = vector.multi_reduction <add>, %24, %cst_18 [1] : vector<2x10xf32> to vector<2xf32>
    %26 = vector.shape_cast %25 : vector<2xf32> to vector<2x1xf32>
    %27 = vector.broadcast %26 : vector<2x1xf32> to vector<2x10xf32>
    %28 = arith.divf %24, %27 : vector<2x10xf32>
    %c0_19 = arith.constant 0 : index
    %c0_20 = arith.constant 0 : index
    %29 = vector.load %arg8[%c0_19, %c0_20] : memref<2x10xf32, #tpu.memory_space<vmem>>, vector<2x10xf32>
    tpu.vector_store %arg8[%c0_19, %c0_20], %28 {strides = array<i32>} : memref<2x10xf32, #tpu.memory_space<vmem>>, vector<2x10xf32>,
    return
  }
  func.func @transform_0(%arg0: i32) -> (i32, i32) {
    %c0_i32 = arith.constant 0 : i32
    %c0_i32_0 = arith.constant 0 : i32
    return %arg0, %c0_i32 : i32, i32
  }
  func.func @transform_1(%arg0: i32) -> (i32, i32) {
    %c0_i32 = arith.constant 0 : i32
    %c0_i32_0 = arith.constant 0 : i32
    %c0_i32_1 = arith.constant 0 : i32
    return %c0_i32, %c0_i32_0 : i32, i32
  }
  func.func @transform_2(%arg0: i32) -> (i32, i32) {
    %c0_i32 = arith.constant 0 : i32
    %c0_i32_0 = arith.constant 0 : i32
    %c0_i32_1 = arith.constant 0 : i32
    return %c0_i32, %c0_i32_0 : i32, i32
  }
  func.func @transform_3(%arg0: i32) -> (i32, i32) {
    %c0_i32 = arith.constant 0 : i32
    %c0_i32_0 = arith.constant 0 : i32
    %c0_i32_1 = arith.constant 0 : i32
    return %c0_i32, %c0_i32_0 : i32, i32
  }
  func.func @transform_4(%arg0: i32) -> (i32, i32) {
    %c0_i32 = arith.constant 0 : i32
    %c0_i32_0 = arith.constant 0 : i32
    %c0_i32_1 = arith.constant 0 : i32
    return %c0_i32, %c0_i32_0 : i32, i32
  }
  func.func @transform_5(%arg0: i32) -> (i32, i32) {
    %c0_i32 = arith.constant 0 : i32
    %c0_i32_0 = arith.constant 0 : i32
    %c0_i32_1 = arith.constant 0 : i32
    return %c0_i32, %c0_i32_0 : i32, i32
  }
  func.func @transform_6(%arg0: i32) -> (i32, i32) {
    %c0_i32 = arith.constant 0 : i32
    %c0_i32_0 = arith.constant 0 : i32
    %c0_i32_1 = arith.constant 0 : i32
    return %c0_i32, %c0_i32_0 : i32, i32
  }
  func.func @transform_7(%arg0: i32) -> (i32, i32) {
    %c0_i32 = arith.constant 0 : i32
    %c0_i32_0 = arith.constant 0 : i32
    return %arg0, %c0_i32 : i32, i32
  }
}

</mosaic_0001>

<bundles_post_ra>
// kernel: lenet5_forward.3
= control target key start
LH: loop header
LB: loop body
LE: loop exit
PB: predicated region body
PF: predicated region fallthrough
CT: control target
= control target key end

     0   :  { %s2384_s21 = smov 0   ;;  %s3156_s0 = inlined_call_operand.vmem [shape: f32[2,196,25], index: 0, kind: input, shape index: {}]   ;;  %s3157_s1 = inlined_call_operand.vmem [shape: f32[2,196,25], index: 1, kind: input, shape index: {}]   ;;  %s3158_s2 = inlined_call_operand.vmem [shape: f32[2,196,25], index: 2, kind: input, shape index: {}]   ;;  %s3159_s3 = inlined_call_operand.vmem [shape: f32[2,196,25], index: 3, kind: input, shape index: {}]   ;;  %s3160_s4 = inlined_call_operand.vmem [shape: f32[25,6], index: 4, kind: input, shape index: {}]   ;;  %s3161_s5 = inlined_call_operand.vmem [shape: f32[1,6], index: 5, kind: input, shape index: {}]   ;;  %s3162_s6 = inlined_call_operand.vmem [shape: f32[2,196,6], index: 6, kind: output, shape index: {}]  }
   0x1 LB: > { %s1731_s22 = sadd.s32 4294967295, %s2343_s21   ;;  %p1735_p0 = scmp.ge.s32.totalorder %s2343_s21, 1  ;;  %s2343_s21 = sphi %s2384_s21, %s16_s21  }
   0x2   : > { %p242_p1 = scmp.lt.s32.totalorder %s2343_s21, 3 }
   0x4   : > { %p243_p2 = pnand %p1735_p0, %p242_p1 }
   0x5   : > { %v312_v0 = vld [vmem:[%s3160_s4] sm:$0xff] (!%p243_p2)  ;;  %v313_v1 = vld [vmem:[%s3160_s4 + $0x8] sm:$0xff] (!%p243_p2)  ;;  %v314_v2 = vld [vmem:[%s3160_s4 + $0x10] sm:$0xff] (!%p243_p2)  ;;  %vm417_vm0 = vcmask (!%p243_p2), 1040384   ;;  %v2345_v3 = vmov (!%p243_p2), 0.0|0.0   ;;  %p287_p3 = scmp.lt.s32.totalorder (!%p243_p2), %s1731_s22, 1 }
   0x6   : > { %246 = sbr.rel (%p243_p2) target bundleno = 436 (0x1b4), region = 44  ;;  %2296 = vmatprep.subr.bf16.mxu0 (!%p243_p2), %v2345_v3  ;;  %2303 = vmatprep.subr.bf16.mxu1 (!%p243_p2), %v2345_v3  ;;  %v2297_v4 = vpack.c.bf16 (!%p243_p2), %v313_v1, %v312_v0  ;;  %v315_v5 = vld [vmem:[%s3160_s4 + $0x18] sm:$0x1] (!%p243_p2)  ;;  %vm2346_vm1 = vmmov (!%p243_p2), 0   ;;  %v2347_v6 = vmov (!%p243_p2), 0.0   ;;  %vm2348_vm2 = vmmov (!%p243_p2), 1  }
   0x7   : > { %1972 = vmatprep.mubr.msk.f32.mxu0 (!%p243_p2), %vm2346_vm1, %v2347_v6  ;;  %2055 = vmatprep.mubr.msk.f32.mxu1 (!%p243_p2), %vm2346_vm1, %v2347_v6  ;;  %v2300_v7 = vpack.c.bf16 (!%p243_p2), %v315_v5, %v314_v2  ;;  %vm2409_vm3 = vmpackc.low (!%p243_p2), %vm417_vm0, %vm2348_vm2  ;;  %vm341_vm4 = vcmask (!%p243_p2), 203776   ;;  %vm1613_vm5 = vcmask (!%p243_p2), 48128   ;;  %vm1638_vm6 = vcmask (!%p243_p2), 44032  }
   0x8   : > { %2298 = vmatpush3.bf16.msra.mxu0 (!%p243_p2), %v2297_v4  ;;  %2305 = vmatpush3.bf16.msra.mxu1 (!%p243_p2), %v2297_v4 }
   0x9   : > { %2299 = vmatprep.subr.bf16.mxu0 (!%p243_p2), %v2345_v3  ;;  %2306 = vmatprep.subr.bf16.mxu1 (!%p243_p2), %v2345_v3 }
   0xc   : > { %2302 = vmatpush3.bf16.msk.msra.mxu0 (!%p243_p2), %vm2409_vm3, %v2300_v7  ;;  %2309 = vmatpush3.bf16.msk.msra.mxu1 (!%p243_p2), %vm2409_vm3, %v2300_v7 }
   0xd   : > { %s3190_s22 = smov (!%p287_p3, %s1731_s22), 1  ;;  %2310 = vmatprep.subr.bf16.mxu0 %v2345_v3  ;;  %2317 = vmatprep.subr.bf16.mxu1 %v2345_v3 }
   0xe   : > { %s2413_s7 = smul.u32 200, %s3190_s22 }
  0x10   : > { %s2423_s10 = scalar_lea.vmem %s3156_s0, %s2413_s7  ;;  %s2429_s13 = scalar_lea.vmem %s3157_s1, %s2413_s7 }
  0x11   : > { %v316_v9 = vld [vmem:[%s2423_s10] sm:$0xff]  ;;  %v317_v11 = vld [vmem:[%s2423_s10 + $0x8] sm:$0xff]  ;;  %v318_v13 = vld [vmem:[%s2423_s10 + $0x10] sm:$0xff]  ;;  %s2633_s16 = scalar_lea.vmem %s3158_s2, %s2413_s7  ;;  %s2639_s19 = scalar_lea.vmem %s3159_s3, %s2413_s7 }
  0x12   : > { %v611_v10 = vld [vmem:[%s2429_s13] sm:$0xff]  ;;  %1973 = vmatmul.mubr.msk.f32.vlgmr.msra.gmra.mrb[0].mxu0 %vm341_vm4, %v316_v9  ;;  %v612_v12 = vld [vmem:[%s2429_s13 + $0x8] sm:$0xff]  ;;  %v613_v14 = vld [vmem:[%s2429_s13 + $0x10] sm:$0xff]  ;;  %s3006_s25 = scalar_lea.vmem %s3162_s6, %s2413_s7 }
  0x13   : > { %2056 = vmatmul.mubr.msk.f32.vlgmr.msra.gmra.mrb[0].mxu1 %vm341_vm4, %v611_v10  ;;  %2312 = vmatpush3.bf16.msra.mxu0 %v2297_v4  ;;  %v319_v15 = vld [vmem:[%s2423_s10 + $0x18] sm:$0xff]  ;;  %v320_v17 = vld [vmem:[%s2423_s10 + $0x20] sm:$0xff]  ;;  %v321_v19 = vld [vmem:[%s2423_s10 + $0x28] sm:$0xff] }
  0x14   : > { %2319 = vmatpush3.bf16.msra.mxu1 %v2297_v4  ;;  %1975 = vmatprep.mubr.msk.f32.mxu0 %vm2346_vm1, %v2347_v6  ;;  %v614_v16 = vld [vmem:[%s2429_s13 + $0x18] sm:$0xff]  ;;  %v615_v18 = vld [vmem:[%s2429_s13 + $0x20] sm:$0xff]  ;;  %v616_v20 = vld [vmem:[%s2429_s13 + $0x28] sm:$0xff] }
  0x15   : > { %2058 = vmatprep.mubr.msk.f32.mxu1 %vm2346_vm1, %v2347_v6  ;;  %2313 = vmatprep.subr.bf16.mxu0 %v2345_v3  ;;  %v322_v21 = vld [vmem:[%s2423_s10 + $0x30] sm:$0xff]  ;;  %v323_v23 = vld [vmem:[%s2423_s10 + $0x38] sm:$0xff]  ;;  %v324_v25 = vld [vmem:[%s2423_s10 + $0x40] sm:$0xff] }
  0x16   : > { %2320 = vmatprep.subr.bf16.mxu1 %v2345_v3  ;;  %1976 = vmatmul.mubr.msk.f32.gmra.mrb[2].mxu0 %vm341_vm4, %v317_v11  ;;  %v617_v22 = vld [vmem:[%s2429_s13 + $0x30] sm:$0xff]  ;;  %v618_v24 = vld [vmem:[%s2429_s13 + $0x38] sm:$0xff]  ;;  %v619_v26 = vld [vmem:[%s2429_s13 + $0x40] sm:$0xff] }
  0x17   : > { %2059 = vmatmul.mubr.msk.f32.gmra.mrb[2].mxu1 %vm341_vm4, %v612_v12  ;;  %1978 = vmatprep.mubr.msk.f32.mxu0 %vm2346_vm1, %v2347_v6  ;;  %v325_v27 = vld [vmem:[%s2423_s10 + $0x48] sm:$0xff]  ;;  %v326_v29 = vld [vmem:[%s2423_s10 + $0x50] sm:$0xff]  ;;  %v327_v31 = vld [vmem:[%s2423_s10 + $0x58] sm:$0xff] }
  0x18   : > { %2061 = vmatprep.mubr.msk.f32.mxu1 %vm2346_vm1, %v2347_v6  ;;  %2316 = vmatpush3.bf16.msk.msra.mxu0 %vm2409_vm3, %v2300_v7  ;;  %v620_v28 = vld [vmem:[%s2429_s13 + $0x48] sm:$0xff]  ;;  %v621_v30 = vld [vmem:[%s2429_s13 + $0x50] sm:$0xff]  ;;  %v622_v32 = vld [vmem:[%s2429_s13 + $0x58] sm:$0xff] }
  0x19   : > { %2323 = vmatpush3.bf16.msk.msra.mxu1 %vm2409_vm3, %v2300_v7  ;;  %v328_v33 = vld [vmem:[%s2423_s10 + $0x60] sm:$0xff]  ;;  %v329_v35 = vld [vmem:[%s2423_s10 + $0x68] sm:$0xff]  ;;  %v330_v37 = vld [vmem:[%s2423_s10 + $0x70] sm:$0xff] }
  0x1a   : > { %1979 = vmatmul.mubr.msk.f32.gmra.mrb[4].mxu0 %vm341_vm4, %v318_v13  ;;  %v623_v34 = vld [vmem:[%s2429_s13 + $0x60] sm:$0xff]  ;;  %v624_v36 = vld [vmem:[%s2429_s13 + $0x68] sm:$0xff]  ;;  %v625_v38 = vld [vmem:[%s2429_s13 + $0x70] sm:$0xff] }
  0x1b   : > { %2062 = vmatmul.mubr.msk.f32.gmra.mrb[4].mxu1 %vm341_vm4, %v613_v14  ;;  %1981 = vmatprep.mubr.msk.f32.mxu0 %vm2346_vm1, %v2347_v6  ;;  %v331_v39 = vld [vmem:[%s2423_s10 + $0x78] sm:$0xff]  ;;  %v332_v41 = vld [vmem:[%s2423_s10 + $0x80] sm:$0xff]  ;;  %v333_v43 = vld [vmem:[%s2423_s10 + $0x88] sm:$0xff] }
  0x1c   : > { %2064 = vmatprep.mubr.msk.f32.mxu1 %vm2346_vm1, %v2347_v6  ;;  %v626_v40 = vld [vmem:[%s2429_s13 + $0x78] sm:$0xff]  ;;  %v627_v42 = vld [vmem:[%s2429_s13 + $0x80] sm:$0xff]  ;;  %v628_v44 = vld [vmem:[%s2429_s13 + $0x88] sm:$0xff] }
  0x1d   : > { %v334_v45 = vld [vmem:[%s2423_s10 + $0x90] sm:$0xff]  ;;  %v335_v47 = vld [vmem:[%s2423_s10 + $0x98] sm:$0xff]  ;;  %v336_v49 = vld [vmem:[%s2423_s10 + $0xa0] sm:$0xff] }
  0x1e   : > { %1982 = vmatmul.mubr.msk.f32.gmra.mrb[6].mxu0 %vm341_vm4, %v319_v15  ;;  %v629_v46 = vld [vmem:[%s2429_s13 + $0x90] sm:$0xff]  ;;  %v630_v48 = vld [vmem:[%s2429_s13 + $0x98] sm:$0xff]  ;;  %v631_v50 = vld [vmem:[%s2429_s13 + $0xa0] sm:$0xff] }
  0x1f   : > { %2065 = vmatmul.mubr.msk.f32.gmra.mrb[6].mxu1 %vm341_vm4, %v614_v16  ;;  %1984 = vmatprep.mubr.msk.f32.mxu0 %vm2346_vm1, %v2347_v6  ;;  %v337_v51 = vld [vmem:[%s2423_s10 + $0xa8] sm:$0xff]  ;;  %v338_v53 = vld [vmem:[%s2423_s10 + $0xb0] sm:$0xff]  ;;  %v339_v55 = vld [vmem:[%s2423_s10 + $0xb8] sm:$0xff] }
  0x20   : > { %2067 = vmatprep.mubr.msk.f32.mxu1 %vm2346_vm1, %v2347_v6  ;;  %v632_v52 = vld [vmem:[%s2429_s13 + $0xa8] sm:$0xff]  ;;  %v633_v54 = vld [vmem:[%s2429_s13 + $0xb0] sm:$0xff]  ;;  %v634_v56 = vld [vmem:[%s2429_s13 + $0xb8] sm:$0xff] }
  0x21   : > { %v340_v57 = vld [vmem:[%s2423_s10 + $0xc0] sm:$0xf]  ;;  %v902_v61 = vld [vmem:[%s2633_s16 + $0x8] sm:$0xff]  ;;  %v903_v63 = vld [vmem:[%s2633_s16 + $0x10] sm:$0xff] }
  0x22   : > { %1985 = vmatmul.mubr.msk.f32.gmra.mrb[8].mxu0 %vm341_vm4, %v320_v17  ;;  %v635_v58 = vld [vmem:[%s2429_s13 + $0xc0] sm:$0xf]  ;;  %v1192_v62 = vld [vmem:[%s2639_s19 + $0x8] sm:$0xff]  ;;  %v1193_v0 = vld [vmem:[%s2639_s19 + $0x10] sm:$0xff] }
  0x23   : > { %2068 = vmatmul.mubr.msk.f32.gmra.mrb[8].mxu1 %vm341_vm4, %v615_v18  ;;  %1987 = vmatprep.mubr.msk.f32.mxu0 %vm2346_vm1, %v2347_v6  ;;  %v901_v59 = vld [vmem:[%s2633_s16] sm:$0xff]  ;;  %v904_v1 = vld [vmem:[%s2633_s16 + $0x18] sm:$0xff]  ;;  %v906_v5 = vld [vmem:[%s2633_s16 + $0x28] sm:$0xff] }
  0x24   : > { %2070 = vmatprep.mubr.msk.f32.mxu1 %vm2346_vm1, %v2347_v6  ;;  %v1191_v60 = vld [vmem:[%s2639_s19] sm:$0xff]  ;;  %v1194_v2 = vld [vmem:[%s2639_s19 + $0x18] sm:$0xff]  ;;  %v1196_v7 = vld [vmem:[%s2639_s19 + $0x28] sm:$0xff] }
  0x25   : > { %v905_v3 = vld [vmem:[%s2633_s16 + $0x20] sm:$0xff]  ;;  %v907_v8 = vld [vmem:[%s2633_s16 + $0x30] sm:$0xff]  ;;  %v908_v10 = vld [vmem:[%s2633_s16 + $0x38] sm:$0xff] }
  0x26   : > { %1988 = vmatmul.mubr.msk.f32.gmra.mrb[10].mxu0 %vm341_vm4, %v321_v19  ;;  %v1195_v4 = vld [vmem:[%s2639_s19 + $0x20] sm:$0xff]  ;;  %v1197_v9 = vld [vmem:[%s2639_s19 + $0x30] sm:$0xff]  ;;  %v1198_v11 = vld [vmem:[%s2639_s19 + $0x38] sm:$0xff] }
  0x27   : > { %2071 = vmatmul.mubr.msk.f32.gmra.mrb[10].mxu1 %vm341_vm4, %v616_v20  ;;  %1990 = vmatprep.mubr.msk.f32.mxu0 %vm2346_vm1, %v2347_v6  ;;  %v909_v12 = vld [vmem:[%s2633_s16 + $0x40] sm:$0xff]  ;;  %v910_v14 = vld [vmem:[%s2633_s16 + $0x48] sm:$0xff]  ;;  %v911_v16 = vld [vmem:[%s2633_s16 + $0x50] sm:$0xff] }
  0x28   : > { %2073 = vmatprep.mubr.msk.f32.mxu1 %vm2346_vm1, %v2347_v6  ;;  %v1199_v13 = vld [vmem:[%s2639_s19 + $0x40] sm:$0xff]  ;;  %v1200_v15 = vld [vmem:[%s2639_s19 + $0x48] sm:$0xff]  ;;  %v1201_v17 = vld [vmem:[%s2639_s19 + $0x50] sm:$0xff] }
  0x29   : > { %v912_v18 = vld [vmem:[%s2633_s16 + $0x58] sm:$0xff]  ;;  %v913_v20 = vld [vmem:[%s2633_s16 + $0x60] sm:$0xff] }
  0x2a   : > { %1991 = vmatmul.mubr.msk.f32.gmra.mrb[12].mxu0 %vm341_vm4, %v322_v21  ;;  %v1202_v19 = vld [vmem:[%s2639_s19 + $0x58] sm:$0xff]  ;;  %v1203_v21 = vld [vmem:[%s2639_s19 + $0x60] sm:$0xff] }
  0x2b   : > { %2074 = vmatmul.mubr.msk.f32.gmra.mrb[12].mxu1 %vm341_vm4, %v617_v22  ;;  %1993 = vmatprep.mubr.msk.f32.mxu0 %vm2346_vm1, %v2347_v6  ;;  %v914_v22 = vld [vmem:[%s2633_s16 + $0x68] sm:$0xff] }
  0x2c   : > { %2076 = vmatprep.mubr.msk.f32.mxu1 %vm2346_vm1, %v2347_v6 }
  0x2e   : > { %1994 = vmatmul.mubr.msk.f32.gmra.mrb[14].mxu0 %vm341_vm4, %v323_v23  ;;  %v1204_v23 = vld [vmem:[%s2639_s19 + $0x68] sm:$0xff] }
  0x2f   : > { %2077 = vmatmul.mubr.msk.f32.gmra.mrb[14].mxu1 %vm341_vm4, %v618_v24  ;;  %1996 = vmatprep.mubr.msk.f32.mxu0 %vm2346_vm1, %v2347_v6  ;;  %v915_v24 = vld [vmem:[%s2633_s16 + $0x70] sm:$0xff] }
  0x30   : > { %2079 = vmatprep.mubr.msk.f32.mxu1 %vm2346_vm1, %v2347_v6 }
  0x32   : > { %1997 = vmatmul.mubr.msk.f32.gmra.mrb[16].mxu0 %vm341_vm4, %v324_v25  ;;  %v1205_v25 = vld [vmem:[%s2639_s19 + $0x70] sm:$0xff] }
  0x33   : > { %2080 = vmatmul.mubr.msk.f32.gmra.mrb[16].mxu1 %vm341_vm4, %v619_v26  ;;  %1999 = vmatprep.mubr.msk.f32.mxu0 %vm2346_vm1, %v2347_v6  ;;  %v916_v26 = vld [vmem:[%s2633_s16 + $0x78] sm:$0xff] }
  0x34   : > { %2082 = vmatprep.mubr.msk.f32.mxu1 %vm2346_vm1, %v2347_v6 }
  0x36   : > { %2000 = vmatmul.mubr.msk.f32.gmra.mrb[18].mxu0 %vm341_vm4, %v325_v27  ;;  %v1206_v27 = vld [vmem:[%s2639_s19 + $0x78] sm:$0xff] }
  0x37   : > { %2083 = vmatmul.mubr.msk.f32.gmra.mrb[18].mxu1 %vm341_vm4, %v620_v28  ;;  %2002 = vmatprep.mubr.msk.f32.mxu0 %vm2346_vm1, %v2347_v6  ;;  %v917_v28 = vld [vmem:[%s2633_s16 + $0x80] sm:$0xff] }
  0x38   : > { %2085 = vmatprep.mubr.msk.f32.mxu1 %vm2346_vm1, %v2347_v6 }
  0x3a   : > { %2003 = vmatmul.mubr.msk.f32.gmra.mrb[20].mxu0 %vm341_vm4, %v326_v29  ;;  %v1207_v29 = vld [vmem:[%s2639_s19 + $0x80] sm:$0xff] }
  0x3b   : > { %2086 = vmatmul.mubr.msk.f32.gmra.mrb[20].mxu1 %vm341_vm4, %v621_v30  ;;  %2005 = vmatprep.mubr.msk.f32.mxu0 %vm2346_vm1, %v2347_v6  ;;  %v918_v30 = vld [vmem:[%s2633_s16 + $0x88] sm:$0xff] }
  0x3c   : > { %2088 = vmatprep.mubr.msk.f32.mxu1 %vm2346_vm1, %v2347_v6 }
  0x3e   : > { %2006 = vmatmul.mubr.msk.f32.gmra.mrb[22].mxu0 %vm341_vm4, %v327_v31  ;;  %v1208_v31 = vld [vmem:[%s2639_s19 + $0x88] sm:$0xff] }
  0x3f   : > { %2089 = vmatmul.mubr.msk.f32.gmra.mrb[22].mxu1 %vm341_vm4, %v622_v32  ;;  %2008 = vmatprep.mubr.msk.f32.mxu0 %vm2346_vm1, %v2347_v6  ;;  %v919_v32 = vld [vmem:[%s2633_s16 + $0x90] sm:$0xff] }
  0x40   : > { %2091 = vmatprep.mubr.msk.f32.mxu1 %vm2346_vm1, %v2347_v6 }
  0x42   : > { %2009 = vmatmul.mubr.msk.f32.gmra.mrb[24].mxu0 %vm341_vm4, %v328_v33  ;;  %v1209_v33 = vld [vmem:[%s2639_s19 + $0x90] sm:$0xff] }
  0x43   : > { %2092 = vmatmul.mubr.msk.f32.gmra.mrb[24].mxu1 %vm341_vm4, %v623_v34  ;;  %2011 = vmatprep.mubr.msk.f32.mxu0 %vm2346_vm1, %v2347_v6  ;;  %v920_v34 = vld [vmem:[%s2633_s16 + $0x98] sm:$0xff] }
  0x44   : > { %2094 = vmatprep.mubr.msk.f32.mxu1 %vm2346_vm1, %v2347_v6 }
  0x46   : > { %2012 = vmatmul.mubr.msk.f32.gmra.mrb[26].mxu0 %vm341_vm4, %v329_v35  ;;  %v1210_v35 = vld [vmem:[%s2639_s19 + $0x98] sm:$0xff] }
  0x47   : > { %2095 = vmatmul.mubr.msk.f32.gmra.mrb[26].mxu1 %vm341_vm4, %v624_v36  ;;  %2014 = vmatprep.mubr.msk.f32.mxu0 %vm2346_vm1, %v2347_v6  ;;  %v921_v36 = vld [vmem:[%s2633_s16 + $0xa0] sm:$0xff] }
  0x48   : > { %2097 = vmatprep.mubr.msk.f32.mxu1 %vm2346_vm1, %v2347_v6 }
  0x4a   : > { %2015 = vmatmul.mubr.msk.f32.gmra.mrb[28].mxu0 %vm341_vm4, %v330_v37  ;;  %v1211_v37 = vld [vmem:[%s2639_s19 + $0xa0] sm:$0xff] }
  0x4b   : > { %2098 = vmatmul.mubr.msk.f32.gmra.mrb[28].mxu1 %vm341_vm4, %v625_v38  ;;  %2017 = vmatprep.mubr.msk.f32.mxu0 %vm2346_vm1, %v2347_v6  ;;  %v922_v38 = vld [vmem:[%s2633_s16 + $0xa8] sm:$0xff] }
  0x4c   : > { %2100 = vmatprep.mubr.msk.f32.mxu1 %vm2346_vm1, %v2347_v6 }
  0x4e   : > { %2018 = vmatmul.mubr.msk.f32.gmra.mrb[30].mxu0 %vm341_vm4, %v331_v39  ;;  %v1212_v39 = vld [vmem:[%s2639_s19 + $0xa8] sm:$0xff] }
  0x4f   : > { %2101 = vmatmul.mubr.msk.f32.gmra.mrb[30].mxu1 %vm341_vm4, %v626_v40  ;;  %2020 = vmatprep.mubr.msk.f32.mxu0 %vm2346_vm1, %v2347_v6  ;;  %v923_v40 = vld [vmem:[%s2633_s16 + $0xb0] sm:$0xff] }
  0x50   : > { %2103 = vmatprep.mubr.msk.f32.mxu1 %vm2346_vm1, %v2347_v6 }
  0x52   : > { %2021 = vmatmul.mubr.msk.f32.gmra.mrb[32].mxu0 %vm341_vm4, %v332_v41  ;;  %v1213_v41 = vld [vmem:[%s2639_s19 + $0xb0] sm:$0xff] }
  0x53   : > { %2104 = vmatmul.mubr.msk.f32.gmra.mrb[32].mxu1 %vm341_vm4, %v627_v42  ;;  %2023 = vmatprep.mubr.msk.f32.mxu0 %vm2346_vm1, %v2347_v6  ;;  %v924_v42 = vld [vmem:[%s2633_s16 + $0xb8] sm:$0xff] }
  0x54   : > { %2106 = vmatprep.mubr.msk.f32.mxu1 %vm2346_vm1, %v2347_v6 }
  0x56   : > { %2024 = vmatmul.mubr.msk.f32.gmra.mrb[34].mxu0 %vm341_vm4, %v333_v43  ;;  %v1214_v43 = vld [vmem:[%s2639_s19 + $0xb8] sm:$0xff] }
  0x57   : > { %2107 = vmatmul.mubr.msk.f32.gmra.mrb[34].mxu1 %vm341_vm4, %v628_v44  ;;  %2026 = vmatprep.mubr.msk.f32.mxu0 %vm2346_vm1, %v2347_v6  ;;  %v925_v44 = vld [vmem:[%s2633_s16 + $0xc0] sm:$0xf] }
  0x58   : > { %2109 = vmatprep.mubr.msk.f32.mxu1 %vm2346_vm1, %v2347_v6 }
  0x5a   : > { %2027 = vmatmul.mubr.msk.f32.gmra.mrb[36].mxu0 %vm341_vm4, %v334_v45  ;;  %v1215_v45 = vld [vmem:[%s2639_s19 + $0xc0] sm:$0xf] }
  0x5b   : > { %2110 = vmatmul.mubr.msk.f32.gmra.mrb[36].mxu1 %vm341_vm4, %v629_v46  ;;  %2029 = vmatprep.mubr.msk.f32.mxu0 %vm2346_vm1, %v2347_v6 }
  0x5c   : > { %2112 = vmatprep.mubr.msk.f32.mxu1 %vm2346_vm1, %v2347_v6 }
  0x5e   : > { %2030 = vmatmul.mubr.msk.f32.gmra.mrb[38].mxu0 %vm341_vm4, %v335_v47 }
  0x5f   : > { %2113 = vmatmul.mubr.msk.f32.gmra.mrb[38].mxu1 %vm341_vm4, %v630_v48  ;;  %2032 = vmatprep.mubr.msk.f32.mxu0 %vm2346_vm1, %v2347_v6 }
  0x60   : > { %2115 = vmatprep.mubr.msk.f32.mxu1 %vm2346_vm1, %v2347_v6 }
  0x62   : > { %2033 = vmatmul.mubr.msk.f32.gmra.mrb[40].mxu0 %vm341_vm4, %v336_v49 }
  0x63   : > { %2116 = vmatmul.mubr.msk.f32.gmra.mrb[40].mxu1 %vm341_vm4, %v631_v50  ;;  %2035 = vmatprep.mubr.msk.f32.mxu0 %vm2346_vm1, %v2347_v6 }
  0x64   : > { %2118 = vmatprep.mubr.msk.f32.mxu1 %vm2346_vm1, %v2347_v6 }
  0x66   : > { %2036 = vmatmul.mubr.msk.f32.gmra.mrb[42].mxu0 %vm341_vm4, %v337_v51 }
  0x67   : > { %2119 = vmatmul.mubr.msk.f32.gmra.mrb[42].mxu1 %vm341_vm4, %v632_v52  ;;  %2038 = vmatprep.mubr.msk.f32.mxu0 %vm2346_vm1, %v2347_v6 }
  0x68   : > { %2121 = vmatprep.mubr.msk.f32.mxu1 %vm2346_vm1, %v2347_v6 }
  0x6a   : > { %2039 = vmatmul.mubr.msk.f32.gmra.mrb[44].mxu0 %vm341_vm4, %v338_v53 }
  0x6b   : > { %2122 = vmatmul.mubr.msk.f32.gmra.mrb[44].mxu1 %vm341_vm4, %v633_v54  ;;  %2041 = vmatprep.mubr.msk.f32.mxu0 %vm2346_vm1, %v2347_v6 }
  0x6c   : > { %2124 = vmatprep.mubr.msk.f32.mxu1 %vm2346_vm1, %v2347_v6 }
  0x6e   : > { %2042 = vmatmul.mubr.msk.f32.gmra.mrb[46].mxu0 %vm341_vm4, %v339_v55 }
  0x6f   : > { %2125 = vmatmul.mubr.msk.f32.gmra.mrb[46].mxu1 %vm341_vm4, %v634_v56  ;;  %2044 = vmatprep.mubr.msk.f32.mxu0 %vm2346_vm1, %v2347_v6 }
  0x70   : > { %2127 = vmatprep.mubr.msk.f32.mxu1 %vm2346_vm1, %v2347_v6 }
  0x72   : > { %2045 = vmatmul.mubr.msk.f32.gmra.mrb[48].mxu0 %vm341_vm4, %v340_v57 }
  0x73   : > { %2128 = vmatmul.mubr.msk.f32.gmra.mrb[48].mxu1 %vm341_vm4, %v635_v58  ;;  %2138 = vmatprep.mubr.msk.f32.mxu0 %vm2346_vm1, %v2347_v6 }
  0x74   : > { %2221 = vmatprep.mubr.msk.f32.mxu1 %vm2346_vm1, %v2347_v6 }
  0x76   : > { %2139 = vmatmul.mubr.msk.f32.vlgmr.msra.gmra.mrb[50].mxu0 %vm341_vm4, %v901_v59 }
  0x77   : > { %2222 = vmatmul.mubr.msk.f32.vlgmr.msra.gmra.mrb[50].mxu1 %vm341_vm4, %v1191_v60  ;;  %2141 = vmatprep.mubr.msk.f32.mxu0 %vm2346_vm1, %v2347_v6 }
  0x78   : > { %2224 = vmatprep.mubr.msk.f32.mxu1 %vm2346_vm1, %v2347_v6 }
  0x7a   : > { %2142 = vmatmul.mubr.msk.f32.gmra.mrb[52].mxu0 %vm341_vm4, %v902_v61 }
  0x7b   : > { %2225 = vmatmul.mubr.msk.f32.gmra.mrb[52].mxu1 %vm341_vm4, %v1192_v62  ;;  %2144 = vmatprep.mubr.msk.f32.mxu0 %vm2346_vm1, %v2347_v6 }
  0x7c   : > { %2227 = vmatprep.mubr.msk.f32.mxu1 %vm2346_vm1, %v2347_v6 }
  0x7e   : > { %2145 = vmatmul.mubr.msk.f32.gmra.mrb[54].mxu0 %vm341_vm4, %v903_v63 }
  0x7f   : > { %2228 = vmatmul.mubr.msk.f32.gmra.mrb[54].mxu1 %vm341_vm4, %v1193_v0  ;;  %2147 = vmatprep.mubr.msk.f32.mxu0 %vm2346_vm1, %v2347_v6 }
  0x80   : > { %2230 = vmatprep.mubr.msk.f32.mxu1 %vm2346_vm1, %v2347_v6 }
  0x82   : > { %2148 = vmatmul.mubr.msk.f32.gmra.mrb[56].mxu0 %vm341_vm4, %v904_v1 }
  0x83   : > { %2231 = vmatmul.mubr.msk.f32.gmra.mrb[56].mxu1 %vm341_vm4, %v1194_v2  ;;  %2150 = vmatprep.mubr.msk.f32.mxu0 %vm2346_vm1, %v2347_v6 }
  0x84   : > { %2233 = vmatprep.mubr.msk.f32.mxu1 %vm2346_vm1, %v2347_v6 }
  0x86   : > { %2151 = vmatmul.mubr.msk.f32.gmra.mrb[58].mxu0 %vm341_vm4, %v905_v3 }
  0x87   : > { %2234 = vmatmul.mubr.msk.f32.gmra.mrb[58].mxu1 %vm341_vm4, %v1195_v4  ;;  %2153 = vmatprep.mubr.msk.f32.mxu0 %vm2346_vm1, %v2347_v6 }
  0x88   : > { %2236 = vmatprep.mubr.msk.f32.mxu1 %vm2346_vm1, %v2347_v6 }
  0x8a   : > { %2154 = vmatmul.mubr.msk.f32.gmra.mrb[60].mxu0 %vm341_vm4, %v906_v5 }
  0x8b   : > { %2237 = vmatmul.mubr.msk.f32.gmra.mrb[60].mxu1 %vm341_vm4, %v1196_v7  ;;  %2156 = vmatprep.mubr.msk.f32.mxu0 %vm2346_vm1, %v2347_v6 }
  0x8c   : > { %2239 = vmatprep.mubr.msk.f32.mxu1 %vm2346_vm1, %v2347_v6 }
  0x8e   : > { %2157 = vmatmul.mubr.msk.f32.gmra.mrb[62].mxu0 %vm341_vm4, %v907_v8 }
  0x8f   : > { %2240 = vmatmul.mubr.msk.f32.gmra.mrb[62].mxu1 %vm341_vm4, %v1197_v9  ;;  %2159 = vmatprep.mubr.msk.f32.mxu0 %vm2346_vm1, %v2347_v6 }
  0x90   : > { %2242 = vmatprep.mubr.msk.f32.mxu1 %vm2346_vm1, %v2347_v6 }
  0x92   : > { %2160 = vmatmul.mubr.msk.f32.gmra.mrb[64].mxu0 %vm341_vm4, %v908_v10 }
  0x93   : > { %2243 = vmatmul.mubr.msk.f32.gmra.mrb[64].mxu1 %vm341_vm4, %v1198_v11  ;;  %2162 = vmatprep.mubr.msk.f32.mxu0 %vm2346_vm1, %v2347_v6 }
  0x94   : > { %2245 = vmatprep.mubr.msk.f32.mxu1 %vm2346_vm1, %v2347_v6 }
  0x96   : > { %2163 = vmatmul.mubr.msk.f32.gmra.mrb[66].mxu0 %vm341_vm4, %v909_v12 }
  0x97   : > { %2246 = vmatmul.mubr.msk.f32.gmra.mrb[66].mxu1 %vm341_vm4, %v1199_v13  ;;  %2165 = vmatprep.mubr.msk.f32.mxu0 %vm2346_vm1, %v2347_v6 }
  0x98   : > { %2248 = vmatprep.mubr.msk.f32.mxu1 %vm2346_vm1, %v2347_v6 }
  0x9a   : > { %2166 = vmatmul.mubr.msk.f32.gmra.mrb[68].mxu0 %vm341_vm4, %v910_v14 }
  0x9b   : > { %2249 = vmatmul.mubr.msk.f32.gmra.mrb[68].mxu1 %vm341_vm4, %v1200_v15  ;;  %2168 = vmatprep.mubr.msk.f32.mxu0 %vm2346_vm1, %v2347_v6 }
  0x9c   : > { %2251 = vmatprep.mubr.msk.f32.mxu1 %vm2346_vm1, %v2347_v6 }
  0x9e   : > { %2169 = vmatmul.mubr.msk.f32.gmra.mrb[70].mxu0 %vm341_vm4, %v911_v16 }
  0x9f   : > { %2252 = vmatmul.mubr.msk.f32.gmra.mrb[70].mxu1 %vm341_vm4, %v1201_v17  ;;  %2171 = vmatprep.mubr.msk.f32.mxu0 %vm2346_vm1, %v2347_v6 }
  0xa0   : > { %2254 = vmatprep.mubr.msk.f32.mxu1 %vm2346_vm1, %v2347_v6 }
  0xa2   : > { %2172 = vmatmul.mubr.msk.f32.gmra.mrb[72].mxu0 %vm341_vm4, %v912_v18 }
  0xa3   : > { %2255 = vmatmul.mubr.msk.f32.gmra.mrb[72].mxu1 %vm341_vm4, %v1202_v19  ;;  %2174 = vmatprep.mubr.msk.f32.mxu0 %vm2346_vm1, %v2347_v6 }
  0xa4   : > { %2257 = vmatprep.mubr.msk.f32.mxu1 %vm2346_vm1, %v2347_v6 }
  0xa6   : > { %2175 = vmatmul.mubr.msk.f32.gmra.mrb[74].mxu0 %vm341_vm4, %v913_v20 }
  0xa7   : > { %2258 = vmatmul.mubr.msk.f32.gmra.mrb[74].mxu1 %vm341_vm4, %v1203_v21  ;;  %2177 = vmatprep.mubr.msk.f32.mxu0 %vm2346_vm1, %v2347_v6 }
  0xa8   : > { %2260 = vmatprep.mubr.msk.f32.mxu1 %vm2346_vm1, %v2347_v6 }
  0xaa   : > { %2178 = vmatmul.mubr.msk.f32.gmra.mrb[76].mxu0 %vm341_vm4, %v914_v22 }
  0xab   : > { %2261 = vmatmul.mubr.msk.f32.gmra.mrb[76].mxu1 %vm341_vm4, %v1204_v23  ;;  %2180 = vmatprep.mubr.msk.f32.mxu0 %vm2346_vm1, %v2347_v6 }
  0xac   : > { %2263 = vmatprep.mubr.msk.f32.mxu1 %vm2346_vm1, %v2347_v6 }
  0xae   : > { %2181 = vmatmul.mubr.msk.f32.gmra.mrb[78].mxu0 %vm341_vm4, %v915_v24 }
  0xaf   : > { %2264 = vmatmul.mubr.msk.f32.gmra.mrb[78].mxu1 %vm341_vm4, %v1205_v25  ;;  %2183 = vmatprep.mubr.msk.f32.mxu0 %vm2346_vm1, %v2347_v6 }
  0xb0   : > { %2266 = vmatprep.mubr.msk.f32.mxu1 %vm2346_vm1, %v2347_v6 }
  0xb2   : > { %2184 = vmatmul.mubr.msk.f32.gmra.mrb[80].mxu0 %vm341_vm4, %v916_v26 }
  0xb3   : > { %2267 = vmatmul.mubr.msk.f32.gmra.mrb[80].mxu1 %vm341_vm4, %v1206_v27  ;;  %2186 = vmatprep.mubr.msk.f32.mxu0 %vm2346_vm1, %v2347_v6 }
  0xb4   : > { %2269 = vmatprep.mubr.msk.f32.mxu1 %vm2346_vm1, %v2347_v6 }
  0xb6   : > { %2187 = vmatmul.mubr.msk.f32.gmra.mrb[82].mxu0 %vm341_vm4, %v917_v28 }
  0xb7   : > { %2270 = vmatmul.mubr.msk.f32.gmra.mrb[82].mxu1 %vm341_vm4, %v1207_v29  ;;  %2189 = vmatprep.mubr.msk.f32.mxu0 %vm2346_vm1, %v2347_v6 }
  0xb8   : > { %2272 = vmatprep.mubr.msk.f32.mxu1 %vm2346_vm1, %v2347_v6 }
  0xba   : > { %2190 = vmatmul.mubr.msk.f32.gmra.mrb[84].mxu0 %vm341_vm4, %v918_v30 }
  0xbb   : > { %2273 = vmatmul.mubr.msk.f32.gmra.mrb[84].mxu1 %vm341_vm4, %v1208_v31  ;;  %2192 = vmatprep.mubr.msk.f32.mxu0 %vm2346_vm1, %v2347_v6 }
  0xbc   : > { %2275 = vmatprep.mubr.msk.f32.mxu1 %vm2346_vm1, %v2347_v6 }
  0xbe   : > { %2193 = vmatmul.mubr.msk.f32.gmra.mrb[86].mxu0 %vm341_vm4, %v919_v32 }
  0xbf   : > { %2276 = vmatmul.mubr.msk.f32.gmra.mrb[86].mxu1 %vm341_vm4, %v1209_v33  ;;  %2195 = vmatprep.mubr.msk.f32.mxu0 %vm2346_vm1, %v2347_v6 }
  0xc0   : > { %2278 = vmatprep.mubr.msk.f32.mxu1 %vm2346_vm1, %v2347_v6 }
  0xc2   : > { %2196 = vmatmul.mubr.msk.f32.gmra.mrb[88].mxu0 %vm341_vm4, %v920_v34 }
  0xc3   : > { %2279 = vmatmul.mubr.msk.f32.gmra.mrb[88].mxu1 %vm341_vm4, %v1210_v35  ;;  %2198 = vmatprep.mubr.msk.f32.mxu0 %vm2346_vm1, %v2347_v6 }
  0xc4   : > { %2281 = vmatprep.mubr.msk.f32.mxu1 %vm2346_vm1, %v2347_v6 }
  0xc6   : > { %2199 = vmatmul.mubr.msk.f32.gmra.mrb[90].mxu0 %vm341_vm4, %v921_v36 }
  0xc7   : > { %2282 = vmatmul.mubr.msk.f32.gmra.mrb[90].mxu1 %vm341_vm4, %v1211_v37  ;;  %2201 = vmatprep.mubr.msk.f32.mxu0 %vm2346_vm1, %v2347_v6 }
  0xc8   : > { %2284 = vmatprep.mubr.msk.f32.mxu1 %vm2346_vm1, %v2347_v6 }
  0xca   : > { %2202 = vmatmul.mubr.msk.f32.gmra.mrb[92].mxu0 %vm341_vm4, %v922_v38 }
  0xcb   : > { %2285 = vmatmul.mubr.msk.f32.gmra.mrb[92].mxu1 %vm341_vm4, %v1212_v39  ;;  %2204 = vmatprep.mubr.msk.f32.mxu0 %vm2346_vm1, %v2347_v6 }
  0xcc   : > { %2287 = vmatprep.mubr.msk.f32.mxu1 %vm2346_vm1, %v2347_v6 }
  0xce   : > { %2205 = vmatmul.mubr.msk.f32.gmra.mrb[94].mxu0 %vm341_vm4, %v923_v40 }
  0xcf   : > { %2288 = vmatmul.mubr.msk.f32.gmra.mrb[94].mxu1 %vm341_vm4, %v1213_v41  ;;  %2207 = vmatprep.mubr.msk.f32.mxu0 %vm2346_vm1, %v2347_v6 }
  0xd0   : > { %2290 = vmatprep.mubr.msk.f32.mxu1 %vm2346_vm1, %v2347_v6 }
  0xd2   : > { %2208 = vmatmul.mubr.msk.f32.gmra.mrb[96].mxu0 %vm341_vm4, %v924_v42 }
  0xd3   : > { %2291 = vmatmul.mubr.msk.f32.gmra.mrb[96].mxu1 %vm341_vm4, %v1214_v43  ;;  %2210 = vmatprep.mubr.msk.f32.mxu0 %vm2346_vm1, %v2347_v6 }
  0xd4   : > { %2293 = vmatprep.mubr.msk.f32.mxu1 %vm2346_vm1, %v2347_v6 }
  0xd6   : > { %2211 = vmatmul.mubr.msk.f32.gmra.mrb[98].mxu0 %vm341_vm4, %v925_v44 }
  0xd7   : > { %2294 = vmatmul.mubr.msk.f32.gmra.mrb[98].mxu1 %vm341_vm4, %v1215_v45 }
  0xe5   : > { %v2843_v46 = vpop.f32.mrb[0].mxu0 }
  0xe6   : > { %v2845_v47 = vpop.f32.mrb[0].mxu1  ;;  %v1974_v49 = vpop.f32.mrb[1].mxu0 }
  0xe7   : > { %v1481_v48 = vmax.f32 %v2843_v46, %v2845_v47  ;;  %v2057_v50 = vpop.f32.mrb[1].mxu1 }
  0xe9   : > { %v2849_v51 = vpop.f32.mrb[2].mxu0 }
  0xea   : > { %v2851_v52 = vpop.f32.mrb[2].mxu1  ;;  %v1977_v53 = vpop.f32.mrb[3].mxu0 }
  0xeb   : > { %v2060_v54 = vpop.f32.mrb[3].mxu1  ;;  %v3165_v46 = vmax.f32 %v2849_v51, %v2851_v52 }
  0xed   : > { %v2855_v55 = vpop.f32.mrb[4].mxu0 }
  0xee   : > { %v2857_v56 = vpop.f32.mrb[4].mxu1  ;;  %v1980_v58 = vpop.f32.mrb[5].mxu0 }
  0xef   : > { %v2063_v59 = vpop.f32.mrb[5].mxu1 }
  0xf1   : > { %v2861_v60 = vpop.f32.mrb[6].mxu0 }
  0xf2   : > { %v2863_v61 = vpop.f32.mrb[6].mxu1  ;;  %v1983_v63 = vpop.f32.mrb[7].mxu0 }
  0xf3   : > { %v2066_v0 = vpop.f32.mrb[7].mxu1 }
  0xf5   : > { %v2867_v1 = vpop.f32.mrb[8].mxu0 }
  0xf6   : > { %v2869_v2 = vpop.f32.mrb[8].mxu1  ;;  %v1986_v4 = vpop.f32.mrb[9].mxu0 }
  0xf7   : > { %v2069_v5 = vpop.f32.mrb[9].mxu1 }
  0xf9   : > { %v2873_v7 = vpop.f32.mrb[10].mxu0 }
  0xfa   : > { %v2875_v8 = vpop.f32.mrb[10].mxu1  ;;  %v1989_v10 = vpop.f32.mrb[11].mxu0 }
  0xfb   : > { %v2072_v11 = vpop.f32.mrb[11].mxu1 }
  0xfd   : > { %v2879_v12 = vpop.f32.mrb[12].mxu0 }
  0xfe   : > { %v2881_v13 = vpop.f32.mrb[12].mxu1  ;;  %v1992_v15 = vpop.f32.mrb[13].mxu0 }
  0xff   : > { %v2075_v16 = vpop.f32.mrb[13].mxu1 }
 0x101   : > { %v2885_v17 = vpop.f32.mrb[14].mxu0 }
 0x102   : > { %v2887_v18 = vpop.f32.mrb[14].mxu1  ;;  %v1995_v20 = vpop.f32.mrb[15].mxu0 }
 0x103   : > { %v2078_v21 = vpop.f32.mrb[15].mxu1 }
 0x105   : > { %v2891_v22 = vpop.f32.mrb[16].mxu0 }
 0x106   : > { %v2893_v23 = vpop.f32.mrb[16].mxu1  ;;  %v1998_v25 = vpop.f32.mrb[17].mxu0 }
 0x107   : > { %v2081_v26 = vpop.f32.mrb[17].mxu1 }
 0x109   : > { %v2897_v27 = vpop.f32.mrb[18].mxu0 }
 0x10a   : > { %v2899_v28 = vpop.f32.mrb[18].mxu1  ;;  %v2001_v30 = vpop.f32.mrb[19].mxu0 }
 0x10b   : > { %v2084_v31 = vpop.f32.mrb[19].mxu1 }
 0x10d   : > { %v2903_v32 = vpop.f32.mrb[20].mxu0 }
 0x10e   : > { %v2905_v33 = vpop.f32.mrb[20].mxu1  ;;  %v2004_v35 = vpop.f32.mrb[21].mxu0 }
 0x10f   : > { %v2087_v36 = vpop.f32.mrb[21].mxu1 }
 0x111   : > { %v2909_v37 = vpop.f32.mrb[22].mxu0 }
 0x112   : > { %v2911_v38 = vpop.f32.mrb[22].mxu1  ;;  %v2007_v40 = vpop.f32.mrb[23].mxu0 }
 0x113   : > { %v2090_v41 = vpop.f32.mrb[23].mxu1 }
 0x115   : > { %v2915_v42 = vpop.f32.mrb[24].mxu0 }
 0x116   : > { %v2917_v43 = vpop.f32.mrb[24].mxu1  ;;  %v2010_v45 = vpop.f32.mrb[25].mxu0 }
 0x117   : > { %v2093_v49 = vpop.f32.mrb[25].mxu1 }
 0x119   : > { %v2921_v50 = vpop.f32.mrb[26].mxu0 }
 0x11a   : > { %v2923_v53 = vpop.f32.mrb[26].mxu1  ;;  %v2013_v58 = vpop.f32.mrb[27].mxu0 }
 0x11b   : > { %v2096_v59 = vpop.f32.mrb[27].mxu1 }
 0x11d   : > { %v2927_v63 = vpop.f32.mrb[28].mxu0 }
 0x11e   : > { %v2929_v0 = vpop.f32.mrb[28].mxu1  ;;  %v2016_v5 = vpop.f32.mrb[29].mxu0 }
 0x11f   : > { %v2099_v10 = vpop.f32.mrb[29].mxu1 }
 0x121   : > { %v2933_v11 = vpop.f32.mrb[30].mxu0 }
 0x122   : > { %v2935_v15 = vpop.f32.mrb[30].mxu1  ;;  %v2019_v20 = vpop.f32.mrb[31].mxu0 }
 0x123   : > { %v2102_v21 = vpop.f32.mrb[31].mxu1 }
 0x125   : > { %v2939_v25 = vpop.f32.mrb[32].mxu0 }
 0x126   : > { %v2941_v26 = vpop.f32.mrb[32].mxu1  ;;  %v2022_v31 = vpop.f32.mrb[33].mxu0 }
 0x127   : > { %v2105_v35 = vpop.f32.mrb[33].mxu1 }
 0x129   : > { %v2945_v36 = vpop.f32.mrb[34].mxu0 }
 0x12a   : > { %v2947_v40 = vpop.f32.mrb[34].mxu1  ;;  %v2025_v45 = vpop.f32.mrb[35].mxu0 }
 0x12b   : > { %v2108_v49 = vpop.f32.mrb[35].mxu1 }
 0x12d   : > { %v2951_v58 = vpop.f32.mrb[36].mxu0 }
 0x12e   : > { %v2953_v59 = vpop.f32.mrb[36].mxu1  ;;  %v2028_v10 = vpop.f32.mrb[37].mxu0 }
 0x12f   : > { %v2111_v20 = vpop.f32.mrb[37].mxu1 }
 0x131   : > { %v2957_v21 = vpop.f32.mrb[38].mxu0 }
 0x132   : > { %v2959_v31 = vpop.f32.mrb[38].mxu1  ;;  %v2031_v30 = vpop.f32.mrb[39].mxu0 }
 0x133   : > { %v2114_v41 = vpop.f32.mrb[39].mxu1 }
 0x135   : > { %v2963_v45 = vpop.f32.mrb[40].mxu0 }
 0x136   : > { %v2965_v49 = vpop.f32.mrb[40].mxu1  ;;  %v2034_v4 = vpop.f32.mrb[41].mxu0 }
 0x137   : > { %v2117_v5 = vpop.f32.mrb[41].mxu1 }
 0x139   : > { %v2969_v10 = vpop.f32.mrb[42].mxu0 }
 0x13a   : > { %v2971_v20 = vpop.f32.mrb[42].mxu1  ;;  %v2037_v44 = vpop.f32.mrb[43].mxu0 }
 0x13b   : > { %v2120_v35 = vpop.f32.mrb[43].mxu1 }
 0x13d   : > { %v2975_v30 = vpop.f32.mrb[44].mxu0 }
 0x13e   : > { %v2977_v41 = vpop.f32.mrb[44].mxu1  ;;  %v2040_v34 = vpop.f32.mrb[45].mxu0 }
 0x13f   : > { %v2123_v16 = vpop.f32.mrb[45].mxu1 }
 0x141   : > { %v2981_v4 = vpop.f32.mrb[46].mxu0 }
 0x142   : > { %v2983_v5 = vpop.f32.mrb[46].mxu1  ;;  %v2043_v24 = vpop.f32.mrb[47].mxu0 }
 0x143   : > { %v2126_v54 = vpop.f32.mrb[47].mxu1  ;;  %v2996_v24 = vld [vmem:[%s3161_s5] ss:$0 sm:$0xff] }
 0x145   : > { %v2987_v44 = vpop.f32.mrb[48].mxu0 }
 0x146   : > { %v2989_v35 = vpop.f32.mrb[48].mxu1  ;;  %v2046_v39 = vpop.f32.mrb[49].mxu0 }
 0x147   : > { %v2129_v34 = vpop.f32.mrb[49].mxu1 }
 0x149   : > { %v1067_v16 = vpop.f32.mrb[50].mxu0 }
 0x14a   : > { %v1357_v14 = vpop.f32.mrb[50].mxu1  ;;  %v2140_v3 = vpop.f32.mrb[51].mxu0 }
 0x14b   : > { %v1506_v9 = vmax.f32 %v1067_v16, %v1357_v14  ;;  %v2223_v62 = vpop.f32.mrb[51].mxu1  ;;  %v3166_v16 = vmax.f32 %v2855_v55, %v2857_v56 }
 0x14d   : > { %v1531_v54 = vmax.f32 %v1481_v48, %v1506_v9  ;;  %v1072_v29 = vpop.f32.mrb[52].mxu0 }
 0x14e   : > { %v1362_v57 = vpop.f32.mrb[52].mxu1  ;;  %v2143_v34 = vpop.f32.mrb[53].mxu0 }
 0x14f   : > { %v1563_v19 = vadd.f32 %v2996_v24, %v1531_v54  ;;  %v1507_v39 = vmax.f32 %v1072_v29, %v1362_v57  ;;  %v2226_v6 = vpop.f32.mrb[53].mxu1 }
 0x151   : > { %v1588_v62 = vmax.f32 %v1563_v19, 0.0  ;;  %v1532_v47 = vmax.f32 %v3165_v46, %v1507_v39  ;;  %v1077_v48 = vpop.f32.mrb[54].mxu0 }
 0x152   : > { %v1367_v3 = vpop.f32.mrb[54].mxu1  ;;  %v2146_v9 = vpop.f32.mrb[55].mxu0 }
 0x153   : > { %1614 = vst.msk [vmem:[%s3006_s25] sm:$0xff] %vm1613_vm5, %v1588_v62  ;;  %v1564_v57 = vadd.f32 %v2996_v24, %v1532_v47  ;;  %v1508_v6 = vmax.f32 %v1077_v48, %v1367_v3  ;;  %v2229_v14 = vpop.f32.mrb[55].mxu1  ;;  %v3167_v47 = vmax.f32 %v2861_v60, %v2863_v61 }
 0x155   : > { %v1589_v29 = vmax.f32 %v1564_v57, 0.0  ;;  %v1533_v54 = vmax.f32 %v3166_v16, %v1508_v6  ;;  %v1082_v19 = vpop.f32.mrb[56].mxu0 }
 0x156   : > { %v1372_v34 = vpop.f32.mrb[56].mxu1  ;;  %v2149_v39 = vpop.f32.mrb[57].mxu0 }
 0x157   : > { %1615 = vst.msk [vmem:[%s3006_s25 + $0x8] sm:$0xff] %vm1613_vm5, %v1589_v29  ;;  %v1565_v51 = vadd.f32 %v2996_v24, %v1533_v54  ;;  %v1509_v52 = vmax.f32 %v1082_v19, %v1372_v34  ;;  %v2232_v62 = vpop.f32.mrb[57].mxu1  ;;  %v3168_v29 = vmax.f32 %v2867_v1, %v2869_v2  ;;  %v3169_v39 = vmax.f32 %v2873_v7, %v2875_v8 }
 0x159   : > { %v1590_v46 = vmax.f32 %v1565_v51, 0.0  ;;  %v1534_v48 = vmax.f32 %v3167_v47, %v1509_v52  ;;  %v1087_v3 = vpop.f32.mrb[58].mxu0 }
 0x15a   : > { %v1377_v57 = vpop.f32.mrb[58].mxu1  ;;  %v2152_v6 = vpop.f32.mrb[59].mxu0 }
 0x15b   : > { %1616 = vst.msk [vmem:[%s3006_s25 + $0x10] sm:$0xff] %vm1613_vm5, %v1590_v46  ;;  %v1566_v55 = vadd.f32 %v2996_v24, %v1534_v48  ;;  %v1510_v56 = vmax.f32 %v1087_v3, %v1377_v57  ;;  %v2235_v9 = vpop.f32.mrb[59].mxu1 }
 0x15d   : > { %v1591_v14 = vmax.f32 %v1566_v55, 0.0  ;;  %v1535_v16 = vmax.f32 %v3168_v29, %v1510_v56  ;;  %v1092_v54 = vpop.f32.mrb[60].mxu0  ;;  %v3170_v55 = vmax.f32 %v2879_v12, %v2881_v13 }
 0x15e   : > { %v1382_v19 = vpop.f32.mrb[60].mxu1  ;;  %v2155_v34 = vpop.f32.mrb[61].mxu0 }
 0x15f   : > { %1617 = vst.msk [vmem:[%s3006_s25 + $0x18] sm:$0xff] %vm1613_vm5, %v1591_v14  ;;  %v1567_v60 = vadd.f32 %v2996_v24, %v1535_v16  ;;  %v1511_v61 = vmax.f32 %v1092_v54, %v1382_v19  ;;  %v2238_v51 = vpop.f32.mrb[61].mxu1  ;;  %v3171_v54 = vmax.f32 %v2885_v17, %v2887_v18 }
 0x161   : > { %v1592_v52 = vmax.f32 %v1567_v60, 0.0  ;;  %v1536_v62 = vmax.f32 %v3169_v39, %v1511_v61  ;;  %v1097_v46 = vpop.f32.mrb[62].mxu0  ;;  %v3172_v39 = vmax.f32 %v2891_v22, %v2893_v23 }
 0x162   : > { %v1387_v47 = vpop.f32.mrb[62].mxu1  ;;  %v2158_v48 = vpop.f32.mrb[63].mxu0 }
 0x163   : > { %1618 = vst.msk [vmem:[%s3006_s25 + $0x20] sm:$0xff] %vm1613_vm5, %v1592_v52  ;;  %v1568_v1 = vadd.f32 %v2996_v24, %v1536_v62  ;;  %v1512_v2 = vmax.f32 %v1097_v46, %v1387_v47  ;;  %v2241_v3 = vpop.f32.mrb[63].mxu1 }
 0x164   : > { %v3173_v3 = vmax.f32 %v2897_v27, %v2899_v28 }
 0x165   : > { %v1593_v57 = vmax.f32 %v1568_v1, 0.0  ;;  %v1537_v56 = vmax.f32 %v3170_v55, %v1512_v2  ;;  %v1102_v6 = vpop.f32.mrb[64].mxu0 }
 0x166   : > { %v1392_v9 = vpop.f32.mrb[64].mxu1  ;;  %v2161_v14 = vpop.f32.mrb[65].mxu0 }
 0x167   : > { %1619 = vst.msk [vmem:[%s3006_s25 + $0x28] sm:$0xff] %vm1613_vm5, %v1593_v57  ;;  %v1569_v7 = vadd.f32 %v2996_v24, %v1537_v56  ;;  %v1513_v8 = vmax.f32 %v1102_v6, %v1392_v9  ;;  %v2244_v29 = vpop.f32.mrb[65].mxu1 }
 0x169   : > { %v1594_v16 = vmax.f32 %v1569_v7, 0.0  ;;  %v1538_v19 = vmax.f32 %v3171_v54, %v1513_v8  ;;  %v1107_v60 = vpop.f32.mrb[66].mxu0  ;;  %v3174_v8 = vmax.f32 %v2903_v32, %v2905_v33 }
 0x16a   : > { %v1397_v61 = vpop.f32.mrb[66].mxu1  ;;  %v2164_v34 = vpop.f32.mrb[67].mxu0 }
 0x16b   : > { %1620 = vst.msk [vmem:[%s3006_s25 + $0x30] sm:$0xff] %vm1613_vm5, %v1594_v16  ;;  %v1570_v12 = vadd.f32 %v2996_v24, %v1538_v19  ;;  %v1514_v13 = vmax.f32 %v1107_v60, %v1397_v61  ;;  %v2247_v51 = vpop.f32.mrb[67].mxu1  ;;  %v3175_v61 = vmax.f32 %v2909_v37, %v2911_v38 }
 0x16d   : > { %v1595_v52 = vmax.f32 %v1570_v12, 0.0  ;;  %v1539_v62 = vmax.f32 %v3172_v39, %v1514_v13  ;;  %v1112_v46 = vpop.f32.mrb[68].mxu0 }
 0x16e   : > { %v1402_v47 = vpop.f32.mrb[68].mxu1  ;;  %v2167_v1 = vpop.f32.mrb[69].mxu0 }
 0x16f   : > { %1621 = vst.msk [vmem:[%s3006_s25 + $0x38] sm:$0xff] %vm1613_vm5, %v1595_v52  ;;  %v1571_v17 = vadd.f32 %v2996_v24, %v1539_v62  ;;  %v1515_v18 = vmax.f32 %v1112_v46, %v1402_v47  ;;  %v2250_v2 = vpop.f32.mrb[69].mxu1  ;;  %v3176_v62 = vmax.f32 %v2915_v42, %v2917_v43 }
 0x171   : > { %v1596_v48 = vmax.f32 %v1571_v17, 0.0  ;;  %v1540_v57 = vmax.f32 %v3173_v3, %v1515_v18  ;;  %v1117_v55 = vpop.f32.mrb[70].mxu0 }
 0x172   : > { %v1407_v56 = vpop.f32.mrb[70].mxu1  ;;  %v2170_v6 = vpop.f32.mrb[71].mxu0 }
 0x173   : > { %1622 = vst.msk [vmem:[%s3006_s25 + $0x40] sm:$0xff] %vm1613_vm5, %v1596_v48  ;;  %v1572_v22 = vadd.f32 %v2996_v24, %v1540_v57  ;;  %v1516_v23 = vmax.f32 %v1117_v55, %v1407_v56  ;;  %v2253_v9 = vpop.f32.mrb[71].mxu1  ;;  %v3177_v48 = vmax.f32 %v2921_v50, %v2923_v53  ;;  %v3178_v6 = vmax.f32 %v2927_v63, %v2929_v0 }
 0x175   : > { %v1597_v7 = vmax.f32 %v1572_v22, 0.0  ;;  %v1541_v14 = vmax.f32 %v3174_v8, %v1516_v23  ;;  %v1122_v29 = vpop.f32.mrb[72].mxu0 }
 0x176   : > { %v1412_v16 = vpop.f32.mrb[72].mxu1  ;;  %v2173_v54 = vpop.f32.mrb[73].mxu0 }
 0x177   : > { %1623 = vst.msk [vmem:[%s3006_s25 + $0x48] sm:$0xff] %vm1613_vm5, %v1597_v7  ;;  %v1573_v27 = vadd.f32 %v2996_v24, %v1541_v14  ;;  %v1517_v28 = vmax.f32 %v1122_v29, %v1412_v16  ;;  %v2256_v19 = vpop.f32.mrb[73].mxu1 }
 0x179   : > { %v1598_v60 = vmax.f32 %v1573_v27, 0.0  ;;  %v1542_v12 = vmax.f32 %v3175_v61, %v1517_v28  ;;  %v1127_v13 = vpop.f32.mrb[74].mxu0  ;;  %v3179_v27 = vmax.f32 %v2933_v11, %v2935_v15 }
 0x17a   : > { %v1417_v34 = vpop.f32.mrb[74].mxu1  ;;  %v2176_v51 = vpop.f32.mrb[75].mxu0 }
 0x17b   : > { %1624 = vst.msk [vmem:[%s3006_s25 + $0x50] sm:$0xff] %vm1613_vm5, %v1598_v60  ;;  %v1574_v32 = vadd.f32 %v2996_v24, %v1542_v12  ;;  %v1518_v33 = vmax.f32 %v1127_v13, %v1417_v34  ;;  %v2259_v52 = vpop.f32.mrb[75].mxu1  ;;  %v3180_v13 = vmax.f32 %v2939_v25, %v2941_v26 }
 0x17d   : > { %v1599_v39 = vmax.f32 %v1574_v32, 0.0  ;;  %v1543_v46 = vmax.f32 %v3176_v62, %v1518_v33  ;;  %v1132_v47 = vpop.f32.mrb[76].mxu0  ;;  %v3181_v62 = vmax.f32 %v2945_v36, %v2947_v40 }
 0x17e   : > { %v1422_v17 = vpop.f32.mrb[76].mxu1  ;;  %v2179_v18 = vpop.f32.mrb[77].mxu0 }
 0x17f   : > { %1625 = vst.msk [vmem:[%s3006_s25 + $0x58] sm:$0xff] %vm1613_vm5, %v1599_v39  ;;  %v1575_v37 = vadd.f32 %v2996_v24, %v1543_v46  ;;  %v1519_v38 = vmax.f32 %v1132_v47, %v1422_v17  ;;  %v2262_v1 = vpop.f32.mrb[77].mxu1 }
 0x180   : > { %v3182_v1 = vmax.f32 %v2951_v58, %v2953_v59 }
 0x181   : > { %v1600_v2 = vmax.f32 %v1575_v37, 0.0  ;;  %v1544_v3 = vmax.f32 %v3177_v48, %v1519_v38  ;;  %v1137_v57 = vpop.f32.mrb[78].mxu0 }
 0x182   : > { %v1427_v55 = vpop.f32.mrb[78].mxu1  ;;  %v2182_v56 = vpop.f32.mrb[79].mxu0 }
 0x183   : > { %1626 = vst.msk [vmem:[%s3006_s25 + $0x60] sm:$0xff] %vm1613_vm5, %v1600_v2  ;;  %v1576_v42 = vadd.f32 %v2996_v24, %v1544_v3  ;;  %v1520_v43 = vmax.f32 %v1137_v57, %v1427_v55  ;;  %v2265_v22 = vpop.f32.mrb[79].mxu1 }
 0x185   : > { %v1601_v23 = vmax.f32 %v1576_v42, 0.0  ;;  %v1545_v9 = vmax.f32 %v3178_v6, %v1520_v43  ;;  %v1142_v7 = vpop.f32.mrb[80].mxu0  ;;  %v3183_v43 = vmax.f32 %v2957_v21, %v2959_v31 }
 0x186   : > { %v1432_v8 = vpop.f32.mrb[80].mxu1  ;;  %v2185_v14 = vpop.f32.mrb[81].mxu0 }
 0x187   : > { %1627 = vst.msk [vmem:[%s3006_s25 + $0x68] sm:$0xff] %vm1613_vm5, %v1601_v23  ;;  %v1577_v50 = vadd.f32 %v2996_v24, %v1545_v9  ;;  %v1521_v53 = vmax.f32 %v1142_v7, %v1432_v8  ;;  %v2268_v29 = vpop.f32.mrb[81].mxu1  ;;  %v3184_v8 = vmax.f32 %v2963_v45, %v2965_v49 }
 0x189   : > { %v1602_v16 = vmax.f32 %v1577_v50, 0.0  ;;  %v1546_v28 = vmax.f32 %v3179_v27, %v1521_v53  ;;  %v1147_v54 = vpop.f32.mrb[82].mxu0 }
 0x18a   : > { %v1437_v19 = vpop.f32.mrb[82].mxu1  ;;  %v2188_v60 = vpop.f32.mrb[83].mxu0 }
 0x18b   : > { %1628 = vst.msk [vmem:[%s3006_s25 + $0x70] sm:$0xff] %vm1613_vm5, %v1602_v16  ;;  %v1578_v63 = vadd.f32 %v2996_v24, %v1546_v28  ;;  %v1522_v0 = vmax.f32 %v1147_v54, %v1437_v19  ;;  %v2271_v61 = vpop.f32.mrb[83].mxu1  ;;  %v3185_v28 = vmax.f32 %v2969_v10, %v2971_v20 }
 0x18d   : > { %v1603_v12 = vmax.f32 %v1578_v63, 0.0  ;;  %v1547_v34 = vmax.f32 %v3180_v13, %v1522_v0  ;;  %v1152_v32 = vpop.f32.mrb[84].mxu0 }
 0x18e   : > { %v1442_v33 = vpop.f32.mrb[84].mxu1  ;;  %v2191_v51 = vpop.f32.mrb[85].mxu0 }
 0x18f   : > { %1629 = vst.msk [vmem:[%s3006_s25 + $0x78] sm:$0xff] %vm1613_vm5, %v1603_v12  ;;  %v1579_v11 = vadd.f32 %v2996_v24, %v1547_v34  ;;  %v1523_v15 = vmax.f32 %v1152_v32, %v1442_v33  ;;  %v2274_v52 = vpop.f32.mrb[85].mxu1  ;;  %v3186_v12 = vmax.f32 %v2975_v30, %v2977_v41  ;;  %v3187_v51 = vmax.f32 %v2981_v4, %v2983_v5 }
 0x191   : > { %v1604_v39 = vmax.f32 %v1579_v11, 0.0  ;;  %v1548_v46 = vmax.f32 %v3181_v62, %v1523_v15  ;;  %v1157_v47 = vpop.f32.mrb[86].mxu0 }
 0x192   : > { %v1447_v17 = vpop.f32.mrb[86].mxu1  ;;  %v2194_v37 = vpop.f32.mrb[87].mxu0 }
 0x193   : > { %1630 = vst.msk [vmem:[%s3006_s25 + $0x80] sm:$0xff] %vm1613_vm5, %v1604_v39  ;;  %v1580_v25 = vadd.f32 %v2996_v24, %v1548_v46  ;;  %v1524_v26 = vmax.f32 %v1157_v47, %v1447_v17  ;;  %v2277_v38 = vpop.f32.mrb[87].mxu1 }
 0x195   : > { %v1605_v18 = vmax.f32 %v1580_v25, 0.0  ;;  %v1549_v2 = vmax.f32 %v3182_v1, %v1524_v26  ;;  %v1162_v48 = vpop.f32.mrb[88].mxu0  ;;  %v3188_v25 = vmax.f32 %v2987_v44, %v2989_v35 }
 0x196   : > { %v1452_v3 = vpop.f32.mrb[88].mxu1  ;;  %v2197_v57 = vpop.f32.mrb[89].mxu0 }
 0x197   : > { %1631 = vst.msk [vmem:[%s3006_s25 + $0x88] sm:$0xff] %vm1613_vm5, %v1605_v18  ;;  %v1581_v36 = vadd.f32 %v2996_v24, %v1549_v2  ;;  %v1525_v40 = vmax.f32 %v1162_v48, %v1452_v3  ;;  %v2280_v55 = vpop.f32.mrb[89].mxu1 }
 0x199   : > { %v1606_v42 = vmax.f32 %v1581_v36, 0.0  ;;  %v1550_v56 = vmax.f32 %v3183_v43, %v1525_v40  ;;  %v1167_v22 = vpop.f32.mrb[90].mxu0 }
 0x19a   : > { %v1457_v23 = vpop.f32.mrb[90].mxu1  ;;  %v2200_v6 = vpop.f32.mrb[91].mxu0 }
 0x19b   : > { %1632 = vst.msk [vmem:[%s3006_s25 + $0x90] sm:$0xff] %vm1613_vm5, %v1606_v42  ;;  %v1582_v58 = vadd.f32 %v2996_v24, %v1550_v56  ;;  %v1526_v59 = vmax.f32 %v1167_v22, %v1457_v23  ;;  %v2283_v9 = vpop.f32.mrb[91].mxu1 }
 0x19d   : > { %v1607_v7 = vmax.f32 %v1582_v58, 0.0  ;;  %v1551_v50 = vmax.f32 %v3184_v8, %v1526_v59  ;;  %v1172_v53 = vpop.f32.mrb[92].mxu0 }
 0x19e   : > { %v1462_v14 = vpop.f32.mrb[92].mxu1  ;;  %v2203_v29 = vpop.f32.mrb[93].mxu0 }
 0x19f   : > { %1633 = vst.msk [vmem:[%s3006_s25 + $0x98] sm:$0xff] %vm1613_vm5, %v1607_v7  ;;  %v1583_v21 = vadd.f32 %v2996_v24, %v1551_v50  ;;  %v1527_v31 = vmax.f32 %v1172_v53, %v1462_v14  ;;  %v2286_v16 = vpop.f32.mrb[93].mxu1 }
 0x1a1   : > { %v1608_v27 = vmax.f32 %v1583_v21, 0.0  ;;  %v1552_v54 = vmax.f32 %v3185_v28, %v1527_v31  ;;  %v1177_v19 = vpop.f32.mrb[94].mxu0 }
 0x1a2   : > { %v1467_v63 = vpop.f32.mrb[94].mxu1  ;;  %v2206_v0 = vpop.f32.mrb[95].mxu0 }
 0x1a3   : > { %1634 = vst.msk [vmem:[%s3006_s25 + $0xa0] sm:$0xff] %vm1613_vm5, %v1608_v27  ;;  %v1584_v45 = vadd.f32 %v2996_v24, %v1552_v54  ;;  %v1528_v49 = vmax.f32 %v1177_v19, %v1467_v63  ;;  %v2289_v60 = vpop.f32.mrb[95].mxu1 }
 0x1a5   : > { %v1609_v61 = vmax.f32 %v1584_v45, 0.0  ;;  %v1553_v13 = vmax.f32 %v3186_v12, %v1528_v49  ;;  %v1182_v34 = vpop.f32.mrb[96].mxu0 }
 0x1a6   : > { %v1472_v32 = vpop.f32.mrb[96].mxu1  ;;  %v2209_v33 = vpop.f32.mrb[97].mxu0 }
 0x1a7   : > { %1635 = vst.msk [vmem:[%s3006_s25 + $0xa8] sm:$0xff] %vm1613_vm5, %v1609_v61  ;;  %v1585_v10 = vadd.f32 %v2996_v24, %v1553_v13  ;;  %v1529_v20 = vmax.f32 %v1182_v34, %v1472_v32  ;;  %v2292_v11 = vpop.f32.mrb[97].mxu1 }
 0x1a9   : > { %v1610_v15 = vmax.f32 %v1585_v10, 0.0  ;;  %v1554_v52 = vmax.f32 %v3187_v51, %v1529_v20  ;;  %v1187_v39 = vpop.f32.mrb[98].mxu0 }
 0x1aa   : > { %v1477_v62 = vpop.f32.mrb[98].mxu1  ;;  %v2212_v46 = vpop.f32.mrb[99].mxu0 }
 0x1ab   : > { %1636 = vst.msk [vmem:[%s3006_s25 + $0xb0] sm:$0xff] %vm1613_vm5, %v1610_v15  ;;  %v1586_v30 = vadd.f32 %v2996_v24, %v1554_v52  ;;  %v1530_v41 = vmax.f32 %v1187_v39, %v1477_v62  ;;  %v2295_v47 = vpop.f32.mrb[99].mxu1 }
 0x1ad   : > { %v1611_v17 = vmax.f32 %v1586_v30, 0.0  ;;  %v1555_v26 = vmax.f32 %v3188_v25, %v1530_v41 }
 0x1af   : > { %1637 = vst.msk [vmem:[%s3006_s25 + $0xb8] sm:$0xff] %vm1613_vm5, %v1611_v17  ;;  %v1587_v37 = vadd.f32 %v2996_v24, %v1555_v26 }
 0x1b1   : > { %v1612_v4 = vmax.f32 %v1587_v37, 0.0 }
 0x1b3   : > { %1639 = vst.msk [vmem:[%s3006_s25 + $0xc0] sm:$0xf] %vm1638_vm6, %v1612_v4 }
 0x1b4 PF: > { %s16_s21 = sadd.s32 1, %s2343_s21  }
 0x1b5   : > { %p13_p4 = scmp.ge.s32.totalorder %s16_s21, 4  }
 0x1b7   :  { %15 = sbr.rel (!%p13_p4) target bundleno = 1 (0x1), region = 83 }

// kernel: lenet5_forward.4
= control target key start
LH: loop header
LB: loop body
LE: loop exit
PB: predicated region body
PF: predicated region fallthrough
CT: control target
= control target key end

     0   :  { %s1086_s21 = smov 0   ;;  %s1345_s0 = inlined_call_operand.vmem [shape: f32[2,25,150], index: 0, kind: input, shape index: {}]   ;;  %s1346_s1 = inlined_call_operand.vmem [shape: f32[2,25,150], index: 1, kind: input, shape index: {}]   ;;  %s1347_s2 = inlined_call_operand.vmem [shape: f32[2,25,150], index: 2, kind: input, shape index: {}]   ;;  %s1348_s3 = inlined_call_operand.vmem [shape: f32[2,25,150], index: 3, kind: input, shape index: {}]   ;;  %s1349_s4 = inlined_call_operand.vmem [shape: f32[150,16], index: 4, kind: input, shape index: {}]   ;;  %s1350_s5 = inlined_call_operand.vmem [shape: f32[1,16], index: 5, kind: input, shape index: {}]   ;;  %s1351_s6 = inlined_call_operand.vmem [shape: f32[2,25,16], index: 6, kind: output, shape index: {}]  }
   0x1 LB: > { %s880_s22 = sadd.s32 4294967295, %s1047_s21   ;;  %p884_p0 = scmp.ge.s32.totalorder %s1047_s21, 1  ;;  %s1047_s21 = sphi %s1086_s21, %s16_s21  }
   0x2   : > { %p242_p1 = scmp.lt.s32.totalorder %s1047_s21, 3 }
   0x4   : > { %p243_p2 = pnand %p884_p0, %p242_p1 }
   0x5   : > { %v312_v0 = vld [vmem:[%s1349_s4] sm:$0xff] (!%p243_p2)  ;;  %v313_v1 = vld [vmem:[%s1349_s4 + $0x8] sm:$0xff] (!%p243_p2)  ;;  %v314_v2 = vld [vmem:[%s1349_s4 + $0x10] sm:$0xff] (!%p243_p2)  ;;  %v1049_v3 = vmov (!%p243_p2), 0.0|0.0   ;;  %p287_p3 = scmp.lt.s32.totalorder (!%p243_p2), %s880_s22, 1  ;;  %vm339_vm0 = vcmask (!%p243_p2), 179200  }
   0x6   : > { %246 = sbr.rel (%p243_p2) target bundleno = 317 (0x13d), region = 44  ;;  %923 = vmatprep.subr.bf16.mxu0 (!%p243_p2), %v1049_v3  ;;  %950 = vmatprep.subr.bf16.mxu1 (!%p243_p2), %v1049_v3  ;;  %v1105_v4 = vpack.c.bf16 (!%p243_p2), %v313_v1, %v312_v0  ;;  %v315_v5 = vld [vmem:[%s1349_s4 + $0x18] sm:$0xff] (!%p243_p2)  ;;  %v316_v7 = vld [vmem:[%s1349_s4 + $0x20] sm:$0xff] (!%p243_p2)  ;;  %v317_v8 = vld [vmem:[%s1349_s4 + $0x28] sm:$0xff] (!%p243_p2)  ;;  %v1050_v30 = vmov (!%p243_p2), 0.0   ;;  %vm352_vm1 = vcmask (!%p243_p2), 1045504  }
   0x7   : > { %v1112_v6 = vpack.c.bf16 (!%p243_p2), %v315_v5, %v314_v2  ;;  %v1141_v9 = vpack.c.bf16 (!%p243_p2), %v317_v8, %v316_v7  ;;  %v318_v12 = vld [vmem:[%s1349_s4 + $0x30] sm:$0xff] (!%p243_p2)  ;;  %v319_v13 = vld [vmem:[%s1349_s4 + $0x38] sm:$0xff] (!%p243_p2)  ;;  %v320_v15 = vld [vmem:[%s1349_s4 + $0x40] sm:$0xff] (!%p243_p2)  ;;  %vm783_vm2 = vcmask (!%p243_p2), 130048   ;;  %vm787_vm3 = vcmask (!%p243_p2), 122880  }
   0x8   : > { %925 = vmatpush1.bf16.msra.mxu0 (!%p243_p2), %v1105_v4  ;;  %952 = vmatpush1.bf16.msra.mxu1 (!%p243_p2), %v1105_v4  ;;  %v1157_v14 = vpack.c.bf16 (!%p243_p2), %v319_v13, %v318_v12  ;;  %v321_v16 = vld [vmem:[%s1349_s4 + $0x48] sm:$0xff] (!%p243_p2)  ;;  %v322_v18 = vld [vmem:[%s1349_s4 + $0x50] sm:$0xff] (!%p243_p2)  ;;  %v323_v19 = vld [vmem:[%s1349_s4 + $0x58] sm:$0xff] (!%p243_p2) }
   0x9   : > { %926 = vmatprep.subr.bf16.mxu0 (!%p243_p2), %v1049_v3  ;;  %953 = vmatprep.subr.bf16.mxu1 (!%p243_p2), %v1049_v3  ;;  %v1169_v17 = vpack.c.bf16 (!%p243_p2), %v321_v16, %v320_v15  ;;  %v1181_v20 = vpack.c.bf16 (!%p243_p2), %v323_v19, %v322_v18  ;;  %v324_v21 = vld [vmem:[%s1349_s4 + $0x60] sm:$0xff] (!%p243_p2)  ;;  %v325_v22 = vld [vmem:[%s1349_s4 + $0x68] sm:$0xff] (!%p243_p2)  ;;  %v326_v24 = vld [vmem:[%s1349_s4 + $0x70] sm:$0xff] (!%p243_p2) }
   0xa   : > { %v1193_v23 = vpack.c.bf16 (!%p243_p2), %v325_v22, %v324_v21  ;;  %v327_v25 = vld [vmem:[%s1349_s4 + $0x78] sm:$0xff] (!%p243_p2)  ;;  %v328_v27 = vld [vmem:[%s1349_s4 + $0x80] sm:$0xff] (!%p243_p2)  ;;  %v329_v28 = vld [vmem:[%s1349_s4 + $0x88] sm:$0xff] (!%p243_p2) }
   0xb   : > { %v1205_v26 = vpack.c.bf16 (!%p243_p2), %v327_v25, %v326_v24  ;;  %v1217_v29 = vpack.c.bf16 (!%p243_p2), %v329_v28, %v328_v27  ;;  %v1228_v31 = vld [vmem:[%s1349_s4 + $0x90] sm:$0x3f] (!%p243_p2) }
   0xc   : > { %928 = vmatpush1.bf16.msra.mxu0 (!%p243_p2), %v1112_v6  ;;  %955 = vmatpush1.bf16.msra.mxu1 (!%p243_p2), %v1112_v6 }
   0xd   : > { %s1353_s22 = smov (!%p287_p3, %s880_s22), 1  ;;  %929 = vmatprep.subr.bf16.mxu0 %v1049_v3  ;;  %956 = vmatprep.subr.bf16.mxu1 %v1049_v3 }
   0xe   : > { %s1125_s11 = sshll.u32 %s1353_s22, 6 }
   0xf   : > { %s1131_s14 = scalar_lea.vmem %s1345_s0, %s1125_s11  ;;  %s1137_s17 = scalar_lea.vmem %s1346_s1, %s1125_s11 }
  0x10   : > { %v332_v10 = vld [vmem:[%s1131_s14 + $0x8] sm:$0xff]  ;;  %931 = vmatpush1.bf16.msra.mxu0 %v1141_v9  ;;  %958 = vmatpush1.bf16.msra.mxu1 %v1141_v9  ;;  %v331_v32 = vld [vmem:[%s1131_s14] sm:$0xff]  ;;  %v334_v34 = vld [vmem:[%s1131_s14 + $0x18] sm:$0xff]  ;;  %s1268_s29 = scalar_lea.vmem %s1347_s2, %s1125_s11  ;;  %s1274_s8 = scalar_lea.vmem %s1348_s3, %s1125_s11 }
  0x11   : > { %v442_v11 = vld [vmem:[%s1137_s17 + $0x8] sm:$0xff]  ;;  %896 = vmatprep.mubr.msk.f32.mxu0 %vm339_vm0, %v332_v10  ;;  %932 = vmatprep.subr.bf16.mxu0 %v1049_v3  ;;  %v441_v33 = vld [vmem:[%s1137_s17] sm:$0xff]  ;;  %v444_v35 = vld [vmem:[%s1137_s17 + $0x18] sm:$0xff] }
  0x12   : > { %901 = vmatprep.mubr.msk.f32.mxu1 %vm339_vm0, %v442_v11  ;;  %959 = vmatprep.subr.bf16.mxu1 %v1049_v3  ;;  %v333_v36 = vld [vmem:[%s1131_s14 + $0x10] sm:$0xff]  ;;  %v336_v38 = vld [vmem:[%s1131_s14 + $0x28] sm:$0xff]  ;;  %v335_v40 = vld [vmem:[%s1131_s14 + $0x20] sm:$0xff] }
  0x13   : > { %v443_v37 = vld [vmem:[%s1137_s17 + $0x10] sm:$0xff]  ;;  %v446_v39 = vld [vmem:[%s1137_s17 + $0x28] sm:$0xff]  ;;  %v445_v41 = vld [vmem:[%s1137_s17 + $0x20] sm:$0xff] }
  0x14   : > { %934 = vmatpush1.bf16.msra.mxu0 %v1157_v14  ;;  %961 = vmatpush1.bf16.msra.mxu1 %v1157_v14  ;;  %v338_v42 = vld [vmem:[%s1131_s14 + $0x38] sm:$0x1]  ;;  %v337_v44 = vld [vmem:[%s1131_s14 + $0x30] sm:$0x1]  ;;  %v547_v46 = vld [vmem:[%s1268_s29 + $0x8] sm:$0xff] }
  0x15   : > { %935 = vmatprep.subr.bf16.mxu0 %v1049_v3  ;;  %962 = vmatprep.subr.bf16.mxu1 %v1049_v3  ;;  %v448_v43 = vld [vmem:[%s1137_s17 + $0x38] sm:$0x1]  ;;  %v447_v45 = vld [vmem:[%s1137_s17 + $0x30] sm:$0x1]  ;;  %v652_v47 = vld [vmem:[%s1274_s8 + $0x8] sm:$0xff]  ;;  %s922_s17 = sshll.u32 %s1353_s22, 5 }
  0x16   : > { %v546_v48 = vld [vmem:[%s1268_s29] sm:$0xff]  ;;  %v549_v50 = vld [vmem:[%s1268_s29 + $0x18] sm:$0xff]  ;;  %v548_v52 = vld [vmem:[%s1268_s29 + $0x10] sm:$0xff]  ;;  %s311_s12 = scalar_lea.vmem %s1351_s6, %s922_s17 }
  0x17   : > { %v651_v49 = vld [vmem:[%s1274_s8] sm:$0xff]  ;;  %v654_v51 = vld [vmem:[%s1274_s8 + $0x18] sm:$0xff]  ;;  %v653_v53 = vld [vmem:[%s1274_s8 + $0x10] sm:$0xff] }
  0x18   : > { %937 = vmatpush1.bf16.msra.mxu0 %v1169_v17  ;;  %964 = vmatpush1.bf16.msra.mxu1 %v1169_v17  ;;  %v551_v54 = vld [vmem:[%s1268_s29 + $0x28] sm:$0xff]  ;;  %v550_v56 = vld [vmem:[%s1268_s29 + $0x20] sm:$0xff]  ;;  %v553_v58 = vld [vmem:[%s1268_s29 + $0x38] sm:$0x1] }
  0x19   : > { %938 = vmatprep.subr.bf16.mxu0 %v1049_v3  ;;  %965 = vmatprep.subr.bf16.mxu1 %v1049_v3  ;;  %v656_v55 = vld [vmem:[%s1274_s8 + $0x28] sm:$0xff]  ;;  %v655_v57 = vld [vmem:[%s1274_s8 + $0x20] sm:$0xff]  ;;  %v658_v59 = vld [vmem:[%s1274_s8 + $0x38] sm:$0x1] }
  0x1a   : > { %v552_v60 = vld [vmem:[%s1268_s29 + $0x30] sm:$0x1] }
  0x1b   : > { %v657_v61 = vld [vmem:[%s1274_s8 + $0x30] sm:$0x1] }
  0x1c   : > { %940 = vmatpush1.bf16.msra.mxu0 %v1181_v20  ;;  %967 = vmatpush1.bf16.msra.mxu1 %v1181_v20 }
  0x1d   : > { %941 = vmatprep.subr.bf16.mxu0 %v1049_v3  ;;  %968 = vmatprep.subr.bf16.mxu1 %v1049_v3 }
  0x20   : > { %943 = vmatpush1.bf16.msra.mxu0 %v1193_v23  ;;  %970 = vmatpush1.bf16.msra.mxu1 %v1193_v23 }
  0x21   : > { %944 = vmatprep.subr.bf16.mxu0 %v1049_v3  ;;  %971 = vmatprep.subr.bf16.mxu1 %v1049_v3 }
  0x24   : > { %946 = vmatpush1.bf16.msra.mxu0 %v1205_v26  ;;  %973 = vmatpush1.bf16.msra.mxu1 %v1205_v26 }
  0x25   : > { %947 = vmatprep.subr.bf16.mxu0 %v1049_v3  ;;  %974 = vmatprep.subr.bf16.mxu1 %v1049_v3 }
  0x28   : > { %949 = vmatpush1.bf16.msra.mxu0 %v1217_v29  ;;  %976 = vmatpush1.bf16.msra.mxu1 %v1217_v29 }
  0x29   : > { %392 = vmatprep.subr.mxu0 %v1050_v30  ;;  %497 = vmatprep.subr.mxu1 %v1050_v30 }
  0x2c   : > { %895 = vmatpush1.msk.msra.mxu0 %vm352_vm1, %v1228_v31  ;;  %900 = vmatpush1.msk.msra.mxu1 %vm352_vm1, %v1228_v31 }
  0x2d   : > { %421 = vmatmul.mubr.f32.vlgmr.msra.gmra.mrb[0].mxu0 %v331_v32  ;;  %526 = vmatmul.mubr.f32.vlgmr.msra.gmra.mrb[0].mxu1 %v441_v33 }
  0x2e   : > { %977 = vmatprep.subr.bf16.mxu0 %v1049_v3  ;;  %1004 = vmatprep.subr.bf16.mxu1 %v1049_v3 }
  0x2f   : > { %979 = vmatpush1.bf16.msra.mxu0 %v1105_v4  ;;  %1006 = vmatpush1.bf16.msra.mxu1 %v1105_v4 }
  0x30   : > { %980 = vmatprep.subr.bf16.mxu0 %v1049_v3  ;;  %1007 = vmatprep.subr.bf16.mxu1 %v1049_v3 }
  0x31   : > { %897 = vmatprep.mubr.msk.f32.mxu0 %vm339_vm0, %v334_v34  ;;  %902 = vmatprep.mubr.msk.f32.mxu1 %vm339_vm0, %v444_v35 }
  0x32   : > { %426 = vmatmul.mubr.f32.gmra.mrb[2].mxu0 %v333_v36  ;;  %531 = vmatmul.mubr.f32.gmra.mrb[2].mxu1 %v443_v37 }
  0x33   : > { %982 = vmatpush1.bf16.msra.mxu0 %v1112_v6  ;;  %1009 = vmatpush1.bf16.msra.mxu1 %v1112_v6 }
  0x34   : > { %983 = vmatprep.subr.bf16.mxu0 %v1049_v3  ;;  %1010 = vmatprep.subr.bf16.mxu1 %v1049_v3 }
  0x35   : > { %898 = vmatprep.mubr.msk.f32.mxu0 %vm339_vm0, %v336_v38  ;;  %903 = vmatprep.mubr.msk.f32.mxu1 %vm339_vm0, %v446_v39 }
  0x36   : > { %431 = vmatmul.mubr.f32.gmra.mrb[4].mxu0 %v335_v40  ;;  %536 = vmatmul.mubr.f32.gmra.mrb[4].mxu1 %v445_v41 }
  0x37   : > { %985 = vmatpush1.bf16.msra.mxu0 %v1141_v9  ;;  %1012 = vmatpush1.bf16.msra.mxu1 %v1141_v9 }
  0x38   : > { %986 = vmatprep.subr.bf16.mxu0 %v1049_v3  ;;  %1013 = vmatprep.subr.bf16.mxu1 %v1049_v3 }
  0x39   : > { %899 = vmatprep.mubr.msk.f32.mxu0 %vm339_vm0, %v338_v42  ;;  %904 = vmatprep.mubr.msk.f32.mxu1 %vm339_vm0, %v448_v43 }
  0x3a   : > { %436 = vmatmul.mubr.f32.gmra.mrb[6].mxu0 %v337_v44  ;;  %541 = vmatmul.mubr.f32.gmra.mrb[6].mxu1 %v447_v45 }
  0x3b   : > { %988 = vmatpush1.bf16.msra.mxu0 %v1157_v14  ;;  %1015 = vmatpush1.bf16.msra.mxu1 %v1157_v14 }
  0x3c   : > { %989 = vmatprep.subr.bf16.mxu0 %v1049_v3  ;;  %1016 = vmatprep.subr.bf16.mxu1 %v1049_v3 }
  0x3d   : > { %906 = vmatprep.mubr.msk.f32.mxu0 %vm339_vm0, %v547_v46  ;;  %911 = vmatprep.mubr.msk.f32.mxu1 %vm339_vm0, %v652_v47 }
  0x3f   : > { %991 = vmatpush1.bf16.msra.mxu0 %v1169_v17  ;;  %1018 = vmatpush1.bf16.msra.mxu1 %v1169_v17 }
  0x40   : > { %992 = vmatprep.subr.bf16.mxu0 %v1049_v3  ;;  %1019 = vmatprep.subr.bf16.mxu1 %v1049_v3 }
  0x43   : > { %994 = vmatpush1.bf16.msra.mxu0 %v1181_v20  ;;  %1021 = vmatpush1.bf16.msra.mxu1 %v1181_v20 }
  0x44   : > { %995 = vmatprep.subr.bf16.mxu0 %v1049_v3  ;;  %1022 = vmatprep.subr.bf16.mxu1 %v1049_v3 }
  0x47   : > { %997 = vmatpush1.bf16.msra.mxu0 %v1193_v23  ;;  %1024 = vmatpush1.bf16.msra.mxu1 %v1193_v23  ;;  %v915_v23 = vld [vmem:[%s1350_s5] ss:$0 sm:$0xff] }
  0x48   : > { %998 = vmatprep.subr.bf16.mxu0 %v1049_v3  ;;  %1025 = vmatprep.subr.bf16.mxu1 %v1049_v3 }
  0x4b   : > { %1000 = vmatpush1.bf16.msra.mxu0 %v1205_v26  ;;  %1027 = vmatpush1.bf16.msra.mxu1 %v1205_v26 }
  0x4c   : > { %1001 = vmatprep.subr.bf16.mxu0 %v1049_v3  ;;  %1028 = vmatprep.subr.bf16.mxu1 %v1049_v3 }
  0x4f   : > { %1003 = vmatpush1.bf16.msra.mxu0 %v1217_v29  ;;  %1030 = vmatpush1.bf16.msra.mxu1 %v1217_v29 }
  0x50   : > { %602 = vmatprep.subr.mxu0 %v1050_v30  ;;  %707 = vmatprep.subr.mxu1 %v1050_v30 }
  0x53   : > { %905 = vmatpush1.msk.msra.mxu0 %vm352_vm1, %v1228_v31  ;;  %910 = vmatpush1.msk.msra.mxu1 %vm352_vm1, %v1228_v31 }
  0x54   : > { %631 = vmatmul.mubr.f32.vlgmr.msra.gmra.mrb[8].mxu0 %v546_v48  ;;  %736 = vmatmul.mubr.f32.vlgmr.msra.gmra.mrb[8].mxu1 %v651_v49 }
  0x55   : > { %907 = vmatprep.mubr.msk.f32.mxu0 %vm339_vm0, %v549_v50  ;;  %912 = vmatprep.mubr.msk.f32.mxu1 %vm339_vm0, %v654_v51 }
  0x58   : > { %636 = vmatmul.mubr.f32.gmra.mrb[10].mxu0 %v548_v52  ;;  %741 = vmatmul.mubr.f32.gmra.mrb[10].mxu1 %v653_v53 }
  0x59   : > { %908 = vmatprep.mubr.msk.f32.mxu0 %vm339_vm0, %v551_v54  ;;  %913 = vmatprep.mubr.msk.f32.mxu1 %vm339_vm0, %v656_v55 }
  0x5c   : > { %641 = vmatmul.mubr.f32.gmra.mrb[12].mxu0 %v550_v56  ;;  %746 = vmatmul.mubr.f32.gmra.mrb[12].mxu1 %v655_v57 }
  0x5d   : > { %909 = vmatprep.mubr.msk.f32.mxu0 %vm339_vm0, %v553_v58  ;;  %914 = vmatprep.mubr.msk.f32.mxu1 %vm339_vm0, %v658_v59 }
  0x60   : > { %646 = vmatmul.mubr.f32.gmra.mrb[14].mxu0 %v552_v60  ;;  %751 = vmatmul.mubr.f32.gmra.mrb[14].mxu1 %v657_v61 }
 0x100   : > { %v422_v62 = vpop.f32.mrb[0].mxu0  ;;  %v527_v63 = vpop.f32.mrb[0].mxu1 }
 0x101   : > { %v756_v0 = vmax.f32 %v422_v62, %v527_v63  ;;  %v424_v1 = vpop.f32.mrb[1].mxu0  ;;  %v529_v2 = vpop.f32.mrb[1].mxu1 }
 0x105   : > { %v427_v3 = vpop.f32.mrb[2].mxu0  ;;  %v532_v4 = vpop.f32.mrb[2].mxu1 }
 0x106   : > { %v757_v5 = vmax.f32 %v427_v3, %v532_v4  ;;  %v429_v6 = vpop.f32.mrb[3].mxu0  ;;  %v534_v7 = vpop.f32.mrb[3].mxu1 }
 0x109   : > { %v432_v8 = vpop.f32.mrb[4].mxu0  ;;  %v537_v9 = vpop.f32.mrb[4].mxu1 }
 0x10a   : > { %v758_v10 = vmax.f32 %v432_v8, %v537_v9  ;;  %v434_v11 = vpop.f32.mrb[5].mxu0  ;;  %v539_v12 = vpop.f32.mrb[5].mxu1 }
 0x10d   : > { %v437_v13 = vpop.f32.mrb[6].mxu0  ;;  %v542_v14 = vpop.f32.mrb[6].mxu1 }
 0x10e   : > { %v759_v15 = vmax.f32 %v437_v13, %v542_v14  ;;  %v439_v16 = vpop.f32.mrb[7].mxu0  ;;  %v544_v17 = vpop.f32.mrb[7].mxu1 }
 0x127   : > { %v632_v18 = vpop.f32.mrb[8].mxu0  ;;  %v737_v19 = vpop.f32.mrb[8].mxu1 }
 0x128   : > { %v760_v20 = vmax.f32 %v632_v18, %v737_v19  ;;  %v634_v21 = vpop.f32.mrb[9].mxu0  ;;  %v739_v22 = vpop.f32.mrb[9].mxu1 }
 0x12a   : > { %v764_v24 = vmax.f32 %v756_v0, %v760_v20 }
 0x12b   : > { %v637_v25 = vpop.f32.mrb[10].mxu0  ;;  %v742_v26 = vpop.f32.mrb[10].mxu1 }
 0x12c   : > { %v775_v27 = vadd.f32 %v915_v23, %v764_v24  ;;  %v761_v28 = vmax.f32 %v637_v25, %v742_v26  ;;  %v639_v29 = vpop.f32.mrb[11].mxu0  ;;  %v744_v30 = vpop.f32.mrb[11].mxu1 }
 0x12e   : > { %v779_v31 = vmax.f32 %v775_v27, 0.0  ;;  %v765_v32 = vmax.f32 %v757_v5, %v761_v28 }
 0x12f   : > { %v642_v33 = vpop.f32.mrb[12].mxu0  ;;  %v747_v34 = vpop.f32.mrb[12].mxu1 }
 0x130   : > { %784 = vst.msk [vmem:[%s311_s12] sm:$0xff] %vm783_vm2, %v779_v31  ;;  %v776_v35 = vadd.f32 %v915_v23, %v765_v32  ;;  %v762_v36 = vmax.f32 %v642_v33, %v747_v34  ;;  %v644_v37 = vpop.f32.mrb[13].mxu0  ;;  %v749_v38 = vpop.f32.mrb[13].mxu1 }
 0x132   : > { %v780_v39 = vmax.f32 %v776_v35, 0.0  ;;  %v766_v40 = vmax.f32 %v758_v10, %v762_v36 }
 0x133   : > { %v647_v41 = vpop.f32.mrb[14].mxu0  ;;  %v752_v42 = vpop.f32.mrb[14].mxu1 }
 0x134   : > { %785 = vst.msk [vmem:[%s311_s12 + $0x8] sm:$0xff] %vm783_vm2, %v780_v39  ;;  %v777_v43 = vadd.f32 %v915_v23, %v766_v40  ;;  %v763_v44 = vmax.f32 %v647_v41, %v752_v42  ;;  %v649_v45 = vpop.f32.mrb[15].mxu0  ;;  %v754_v46 = vpop.f32.mrb[15].mxu1 }
 0x136   : > { %v781_v47 = vmax.f32 %v777_v43, 0.0  ;;  %v767_v48 = vmax.f32 %v759_v15, %v763_v44 }
 0x138   : > { %786 = vst.msk [vmem:[%s311_s12 + $0x10] sm:$0xff] %vm783_vm2, %v781_v47  ;;  %v778_v49 = vadd.f32 %v915_v23, %v767_v48 }
 0x13a   : > { %v782_v50 = vmax.f32 %v778_v49, 0.0 }
 0x13c   : > { %788 = vst.msk [vmem:[%s311_s12 + $0x18] sm:$0x1] %vm787_vm3, %v782_v50 }
 0x13d PF: > { %s16_s21 = sadd.s32 1, %s1047_s21  }
 0x13e   : > { %p13_p4 = scmp.ge.s32.totalorder %s16_s21, 4  }
 0x140   :  { %15 = sbr.rel (!%p13_p4) target bundleno = 1 (0x1), region = 83 }

// kernel: lenet5_forward.5
= control target key start
LH: loop header
LB: loop body
LE: loop exit
PB: predicated region body
PF: predicated region fallthrough
CT: control target
= control target key end

     0   :  { %v727_v4 = vmov 0.0|0.0   ;;  %v728_v26 = vmov 1983009808   ;;  %v90_v28 = vlaneseq  ;;  %vm106_vm0 = vcmask 130048   ;;  %s1048_s0 = inlined_call_operand.vmem [shape: f32[2,400], index: 0, kind: input, shape index: {}]   ;;  %s1049_s1 = inlined_call_operand.vmem [shape: f32[400,120], index: 1, kind: input, shape index: {}]   ;;  %s1050_s2 = inlined_call_operand.vmem [shape: f32[1,120], index: 2, kind: input, shape index: {}]   ;;  %s1051_s3 = inlined_call_operand.vmem [shape: f32[120,84], index: 3, kind: input, shape index: {}]   ;;  %s1052_s4 = inlined_call_operand.vmem [shape: f32[1,84], index: 4, kind: input, shape index: {}]   ;;  %s1053_s5 = inlined_call_operand.vmem [shape: f32[84,10], index: 5, kind: input, shape index: {}]   ;;  %s1054_s6 = inlined_call_operand.vmem [shape: f32[1,10], index: 6, kind: input, shape index: {}]   ;;  %s1055_s7 = inlined_call_operand.hbm [shape: f32[2,10], index: 7, kind: output, shape index: {}]  }
   0x1   :  { %v44_v0 = vld [vmem:[%s1049_s1 + $0x80] sm:$0xff]  ;;  %v45_v1 = vld [vmem:[%s1049_s1 + $0x88] sm:$0xff]  ;;  %630 = vmatprep.subr.bf16.mxu1 %v727_v4  ;;  %v46_v10 = vld [vmem:[%s1049_s1 + $0x90] sm:$0xff]  ;;  %v88_v27 = vunpack.c.l.s4 %v728_v26 }
   0x2   :  { %v28_v2 = vld [vmem:[%s1049_s1] sm:$0xff]  ;;  %v598_v3 = vpack.c.bf16 %v45_v1, %v44_v0  ;;  %v29_v5 = vld [vmem:[%s1049_s1 + $0x8] sm:$0xff]  ;;  %v47_v11 = vld [vmem:[%s1049_s1 + $0x98] sm:$0xff]  ;;  %v91_v39 = vshrl.u32 %v90_v28, 7 }
   0x3   :  { %v60_v6 = vld [vmem:[%s1049_s1 + $0x100] sm:$0xff]  ;;  %v61_v7 = vld [vmem:[%s1049_s1 + $0x108] sm:$0xff]  ;;  %v600_v8 = vpack.c.bf16 %v29_v5, %v28_v2  ;;  %v30_v12 = vld [vmem:[%s1049_s1 + $0x10] sm:$0xff]  ;;  %v602_v13 = vpack.c.bf16 %v47_v11, %v46_v10  ;;  %v89_v38 = vunpack.c.0.s8 %v88_v27 }
   0x4   :  { %v631_v9 = vpack.c.bf16 %v61_v7, %v60_v6  ;;  %599 = vmatprep.subr.bf16.mxu0 %v598_v3  ;;  %v31_v14 = vld [vmem:[%s1049_s1 + $0x18] sm:$0xff]  ;;  %v62_v15 = vld [vmem:[%s1049_s1 + $0x110] sm:$0xff]  ;;  %v48_v19 = vld [vmem:[%s1049_s1 + $0xa0] sm:$0xff] }
   0x5   :  { %v63_v16 = vld [vmem:[%s1049_s1 + $0x118] sm:$0xff]  ;;  %601 = vmatpush3.bf16.msra.mxu0 %v600_v8  ;;  %v604_v17 = vpack.c.bf16 %v31_v14, %v30_v12  ;;  %v49_v20 = vld [vmem:[%s1049_s1 + $0xa8] sm:$0xff]  ;;  %v32_v21 = vld [vmem:[%s1049_s1 + $0x20] sm:$0xff]  ;;  %v92_v49 = vsub.s32 %v89_v38, %v91_v39 }
   0x6   :  { %632 = vmatpush1.bf16.msra.mxu1 %v631_v9  ;;  %v634_v18 = vpack.c.bf16 %v63_v16, %v62_v15  ;;  %603 = vmatprep.subr.bf16.mxu0 %v602_v13  ;;  %v606_v22 = vpack.c.bf16 %v49_v20, %v48_v19  ;;  %v33_v23 = vld [vmem:[%s1049_s1 + $0x28] sm:$0xff]  ;;  %v64_v24 = vld [vmem:[%s1049_s1 + $0x120] sm:$0xff]  ;;  %v50_v29 = vld [vmem:[%s1049_s1 + $0xb0] sm:$0xff] }
   0x7   :  { %633 = vmatprep.subr.bf16.mxu1 %v727_v4  ;;  %v65_v25 = vld [vmem:[%s1049_s1 + $0x128] sm:$0xff]  ;;  %v51_v30 = vld [vmem:[%s1049_s1 + $0xb8] sm:$0xff]  ;;  %v608_v31 = vpack.c.bf16 %v33_v23, %v32_v21  ;;  %v34_v33 = vld [vmem:[%s1049_s1 + $0x30] sm:$0xff] }
   0x8   :  { %v637_v32 = vpack.c.bf16 %v65_v25, %v64_v24  ;;  %v610_v34 = vpack.c.bf16 %v51_v30, %v50_v29  ;;  %v35_v35 = vld [vmem:[%s1049_s1 + $0x38] sm:$0xff]  ;;  %v66_v36 = vld [vmem:[%s1049_s1 + $0x130] sm:$0xff]  ;;  %v52_v40 = vld [vmem:[%s1049_s1 + $0xc0] sm:$0xff] }
   0x9   :  { %605 = vmatpush3.bf16.msra.mxu0 %v604_v17  ;;  %v67_v37 = vld [vmem:[%s1049_s1 + $0x138] sm:$0xff]  ;;  %v53_v41 = vld [vmem:[%s1049_s1 + $0xc8] sm:$0xff]  ;;  %v612_v42 = vpack.c.bf16 %v35_v35, %v34_v33  ;;  %v36_v44 = vld [vmem:[%s1049_s1 + $0x40] sm:$0xff] }
   0xa   :  { %635 = vmatpush1.bf16.msra.mxu1 %v634_v18  ;;  %607 = vmatprep.subr.bf16.mxu0 %v606_v22  ;;  %v640_v43 = vpack.c.bf16 %v67_v37, %v66_v36  ;;  %v614_v45 = vpack.c.bf16 %v53_v41, %v52_v40  ;;  %v37_v46 = vld [vmem:[%s1049_s1 + $0x48] sm:$0xff]  ;;  %v68_v47 = vld [vmem:[%s1049_s1 + $0x140] sm:$0xff]  ;;  %v54_v50 = vld [vmem:[%s1049_s1 + $0xd0] sm:$0xff] }
   0xb   :  { %636 = vmatprep.subr.bf16.mxu1 %v727_v4  ;;  %v69_v48 = vld [vmem:[%s1049_s1 + $0x148] sm:$0xff]  ;;  %v55_v51 = vld [vmem:[%s1049_s1 + $0xd8] sm:$0xff]  ;;  %v616_v52 = vpack.c.bf16 %v37_v46, %v36_v44  ;;  %v38_v54 = vld [vmem:[%s1049_s1 + $0x50] sm:$0xff] }
   0xc   :  { %v643_v53 = vpack.c.bf16 %v69_v48, %v68_v47  ;;  %v27_v55 = vld [vmem:[%s1048_s0] sm:$0xff]  ;;  %v618_v56 = vpack.c.bf16 %v55_v51, %v54_v50  ;;  %v39_v57 = vld [vmem:[%s1049_s1 + $0x58] sm:$0xff]  ;;  %v70_v58 = vld [vmem:[%s1049_s1 + $0x150] sm:$0xff] }
   0xd   :  { %609 = vmatpush3.bf16.msra.mxu0 %v608_v31  ;;  %v71_v59 = vld [vmem:[%s1049_s1 + $0x158] sm:$0xff]  ;;  %v86_v60 = vcombine.high %v27_v55, %v27_v55  ;;  %v93_v61 = vrot.slane %v27_v55, %v92_v49  ;;  %v56_v62 = vld [vmem:[%s1049_s1 + $0xe0] sm:$0xff]  ;;  %v57_v63 = vld [vmem:[%s1049_s1 + $0xe8] sm:$0xff]  ;;  %v620_v2 = vpack.c.bf16 %v39_v57, %v38_v54 }
   0xe   :  { %638 = vmatpush1.bf16.msra.mxu1 %v637_v32  ;;  %611 = vmatprep.subr.bf16.mxu0 %v610_v34  ;;  %v646_v3 = vpack.c.bf16 %v71_v59, %v70_v58  ;;  %v40_v5 = vld [vmem:[%s1049_s1 + $0x60] sm:$0xff] }
   0xf   :  { %639 = vmatprep.subr.bf16.mxu1 %v727_v4  ;;  %v101_v0 = vcombine.high %v93_v61, %v93_v61  ;;  %v100_v1 = vrot.slane %v86_v60, %v92_v49 }
  0x11   :  { %613 = vmatpush3.bf16.msra.mxu0 %v612_v42 }
  0x12   :  { %641 = vmatpush1.bf16.msra.mxu1 %v640_v43  ;;  %615 = vmatprep.subr.bf16.mxu0 %v614_v45 }
  0x13   :  { %642 = vmatprep.subr.bf16.mxu1 %v727_v4 }
  0x15   :  { %617 = vmatpush3.bf16.msra.mxu0 %v616_v52 }
  0x16   :  { %644 = vmatpush1.bf16.msra.mxu1 %v643_v53 }
  0x17   :  { %12 = vsyncpa [#allocation3], 0  ;;  %619 = vmatprep.subr.bf16.mxu0 %v618_v56  ;;  %645 = vmatprep.subr.bf16.mxu1 %v727_v4  ;;  %v622_v6 = vpack.c.bf16 %v57_v63, %v56_v62  ;;  %v41_v7 = vld [vmem:[%s1049_s1 + $0x68] sm:$0xff]  ;;  %v72_v8 = vld [vmem:[%s1049_s1 + $0x160] sm:$0xff]  ;;  %v102_v10 = vcombine.high %v100_v1, %v100_v1  ;;  %v729_v46 = vmov 0.0   ;;  %vm730_vm1 = vmmov 0  }
  0x18   :  { %v73_v9 = vld [vmem:[%s1049_s1 + $0x168] sm:$0xff]  ;;  %v58_v11 = vld [vmem:[%s1049_s1 + $0xf0] sm:$0xff]  ;;  %v59_v12 = vld [vmem:[%s1049_s1 + $0xf8] sm:$0xff]  ;;  %173 = vmatprep.mubr.f32.mxu0 %v101_v0  ;;  %v624_v13 = vpack.c.bf16 %v41_v7, %v40_v5  ;;  %vm272_vm2 = vcmask 982016   ;;  %vm369_vm3 = vcmask 1043456   ;;  %vm365_vm4 = vcmask 687104  }
  0x19   :  { %471 = vmatprep.mubr.msk.f32.mxu1 %vm106_vm0, %v102_v10  ;;  %621 = vmatpush3.bf16.msra.mxu0 %v620_v2  ;;  %v649_v14 = vpack.c.bf16 %v73_v9, %v72_v8  ;;  %v42_v15 = vld [vmem:[%s1049_s1 + $0x70] sm:$0xff]  ;;  %v626_v16 = vpack.c.bf16 %v59_v12, %v58_v11  ;;  %v43_v17 = vld [vmem:[%s1049_s1 + $0x78] sm:$0xff]  ;;  %v76_v22 = vld [vmem:[%s1049_s1 + $0x180] sm:$0xff]  ;;  %vm443_vm5 = vcmask 74752  }
  0x1a   :  { %647 = vmatpush1.bf16.msra.mxu1 %v646_v3  ;;  %623 = vmatprep.subr.bf16.mxu0 %v622_v6  ;;  %v74_v18 = vld [vmem:[%s1049_s1 + $0x170] sm:$0xff]  ;;  %v75_v19 = vld [vmem:[%s1049_s1 + $0x178] sm:$0xff]  ;;  %v628_v20 = vpack.c.bf16 %v43_v17, %v42_v15  ;;  %v77_v23 = vld [vmem:[%s1049_s1 + $0x188] sm:$0xff] }
  0x1b   :  { %648 = vmatprep.subr.bf16.mxu1 %v727_v4  ;;  %v652_v21 = vpack.c.bf16 %v75_v19, %v74_v18  ;;  %v250_v24 = vld [vmem:[%s1051_s3] sm:$0xff]  ;;  %v251_v25 = vld [vmem:[%s1051_s3 + $0x8] sm:$0xff]  ;;  %v655_v26 = vpack.c.bf16 %v77_v23, %v76_v22  ;;  %v252_v28 = vld [vmem:[%s1051_s3 + $0x10] sm:$0xff] }
  0x1c   :  { %v658_v27 = vpack.c.bf16 %v251_v25, %v250_v24  ;;  %v253_v29 = vld [vmem:[%s1051_s3 + $0x18] sm:$0xff]  ;;  %v254_v31 = vld [vmem:[%s1051_s3 + $0x20] sm:$0xff]  ;;  %v255_v32 = vld [vmem:[%s1051_s3 + $0x28] sm:$0xff] }
  0x1d   :  { %625 = vmatpush3.bf16.msra.mxu0 %v624_v13  ;;  %v661_v30 = vpack.c.bf16 %v253_v29, %v252_v28  ;;  %v664_v33 = vpack.c.bf16 %v255_v32, %v254_v31  ;;  %v256_v34 = vld [vmem:[%s1051_s3 + $0x30] sm:$0xff]  ;;  %v257_v35 = vld [vmem:[%s1051_s3 + $0x38] sm:$0xff]  ;;  %v258_v37 = vld [vmem:[%s1051_s3 + $0x40] sm:$0xff] }
  0x1e   :  { %650 = vmatpush1.bf16.msra.mxu1 %v649_v14  ;;  %627 = vmatprep.subr.bf16.mxu0 %v626_v16  ;;  %v667_v36 = vpack.c.bf16 %v257_v35, %v256_v34  ;;  %v259_v38 = vld [vmem:[%s1051_s3 + $0x48] sm:$0xff]  ;;  %v260_v40 = vld [vmem:[%s1051_s3 + $0x50] sm:$0xff]  ;;  %v261_v41 = vld [vmem:[%s1051_s3 + $0x58] sm:$0xff] }
  0x1f   :  { %651 = vmatprep.subr.bf16.mxu1 %v727_v4  ;;  %v670_v39 = vpack.c.bf16 %v259_v38, %v258_v37  ;;  %v673_v42 = vpack.c.bf16 %v261_v41, %v260_v40  ;;  %v262_v43 = vld [vmem:[%s1051_s3 + $0x60] sm:$0xff]  ;;  %v263_v44 = vld [vmem:[%s1051_s3 + $0x68] sm:$0xff]  ;;  %v264_v47 = vld [vmem:[%s1051_s3 + $0x70] sm:$0xff] }
  0x20   :  { %v676_v45 = vpack.c.bf16 %v263_v44, %v262_v43  ;;  %v347_v48 = vld [vmem:[%s1053_s5] sm:$0xff]  ;;  %v348_v49 = vld [vmem:[%s1053_s5 + $0x8] sm:$0xff]  ;;  %v349_v50 = vld [vmem:[%s1053_s5 + $0x10] sm:$0xff] }
  0x21   :  { %629 = vmatpush3.bf16.msra.mxu0 %v628_v20  ;;  %v679_v51 = vpack.c.bf16 %v348_v49, %v347_v48  ;;  %v350_v52 = vld [vmem:[%s1053_s5 + $0x18] sm:$0xff]  ;;  %v351_v54 = vld [vmem:[%s1053_s5 + $0x20] sm:$0xff]  ;;  %v352_v55 = vld [vmem:[%s1053_s5 + $0x28] sm:$0xff] }
  0x22   :  { %653 = vmatpush1.bf16.msra.mxu1 %v652_v21  ;;  %657 = vmatprep.subr.bf16.mxu0 %v727_v4  ;;  %v682_v53 = vpack.c.bf16 %v350_v52, %v349_v50  ;;  %v685_v56 = vpack.c.bf16 %v352_v55, %v351_v54  ;;  %v353_v57 = vld [vmem:[%s1053_s5 + $0x30] sm:$0xff]  ;;  %v354_v58 = vld [vmem:[%s1053_s5 + $0x38] sm:$0xff]  ;;  %v470_v62 = vld [vmem:[%s1050_s2] ss:$0 sm:$0xff] }
  0x23   :  { %654 = vmatprep.subr.bf16.mxu1 %v727_v4  ;;  %v688_v59 = vpack.c.bf16 %v354_v58, %v353_v57  ;;  %v355_v6 = vld [vmem:[%s1053_s5 + $0x40] sm:$0xff]  ;;  %v357_v8 = vld [vmem:[%s1053_s5 + $0x50] sm:$0xf] }
  0x24   :  { %174 = vmatmul.mubr.f32.vlgmr.msra.gmra.mrb[0].mxu0 %v93_v61  ;;  %v472_v9 = vld [vmem:[%s1052_s4] ss:$0 sm:$0xff]  ;;  %s731_s4 = smov [#allocation2]  }
  0x25   :  { %659 = vmatpush3.bf16.msra.mxu0 %v658_v27  ;;  %570 = vmatprep.mubr.msk.f32.mxu0 %vm730_vm1, %v729_v46  ;;  %v474_v14 = vld [vmem:[%s1054_s6] ss:$0 sm:$0xff] }
  0x26   :  { %656 = vmatpush1.bf16.msra.mxu1 %v655_v26  ;;  %660 = vmatprep.subr.bf16.mxu0 %v727_v4 }
  0x27   :  { %678 = vmatprep.subr.bf16.mxu1 %v727_v4 }
  0x29   :  { %244 = vmatmul.mubr.f32.vlgmr.msra.gmra.mrb[0].mxu1 %v100_v1  ;;  %662 = vmatpush3.bf16.msra.mxu0 %v661_v30 }
  0x2a   :  { %663 = vmatprep.subr.bf16.mxu0 %v727_v4  ;;  %595 = vmatprep.mubr.msk.f32.mxu1 %vm730_vm1, %v729_v46 }
  0x2b   :  { %680 = vmatpush3.bf16.msra.mxu1 %v679_v51 }
  0x2c   :  { %681 = vmatprep.subr.bf16.mxu1 %v727_v4 }
  0x2d   :  { %665 = vmatpush3.bf16.msra.mxu0 %v664_v33 }
  0x2e   :  { %666 = vmatprep.subr.bf16.mxu0 %v727_v4 }
  0x2f   :  { %683 = vmatpush3.bf16.msra.mxu1 %v682_v53 }
  0x30   :  { %684 = vmatprep.subr.bf16.mxu1 %v727_v4 }
  0x31   :  { %668 = vmatpush3.bf16.msra.mxu0 %v667_v36 }
  0x32   :  { %669 = vmatprep.subr.bf16.mxu0 %v727_v4 }
  0x33   :  { %686 = vmatpush3.bf16.msra.mxu1 %v685_v56 }
  0x34   :  { %687 = vmatprep.subr.bf16.mxu1 %v727_v4 }
  0x35   :  { %671 = vmatpush3.bf16.msra.mxu0 %v670_v39 }
  0x36   :  { %672 = vmatprep.subr.bf16.mxu0 %v727_v4 }
  0x37   :  { %689 = vmatpush3.bf16.msra.mxu1 %v688_v59 }
  0x38   :  { %690 = vmatprep.subr.bf16.mxu1 %v727_v4 }
  0x39   :  { %674 = vmatpush3.bf16.msra.mxu0 %v673_v42 }
  0x3a   :  { %675 = vmatprep.subr.bf16.mxu0 %v727_v4  ;;  %v356_v4 = vld [vmem:[%s1053_s5 + $0x48] sm:$0xff]  ;;  %s462_s5 = sshll.u32 %s731_s4, 4  ;;  %s463_s5 = int_to_ptr.vmem [resolvable:$true] %s462_s5 }
  0x3b   :  { %v691_v7 = vpack.c.bf16 %v356_v4, %v355_v6  ;;  %s703_s6 = scalar_lea.vmem %s463_s5, 32  ;;  %p708_p1 = scmp.lt.s32.totalorder %s463_s5, %s463_s5 }
  0x3c   :  { %p704_p0 = scmp.ne.s32.totalorder %s463_s5, %s703_s6  ;;  %p709_p2 = scmp.lt.s32.totalorder %s703_s6, %s703_s6 }
  0x3d   :  { %677 = vmatpush3.bf16.msra.mxu0 %v676_v45  ;;  %692 = vmatpush3.bf16.msra.mxu1 %v691_v7 }
  0x3e   :  { %568 = vmatprep.subr.mxu0 %v729_v46  ;;  %593 = vmatprep.subr.mxu1 %v729_v46  ;;  %p710_p3 = por %p709_p2, %p708_p1 }
  0x40   :  { %p711_p4 = pnand %p710_p3, %p704_p0 }
  0x41   :  { %569 = vmatpush3.msra.mxu0 %v264_v47  ;;  %594 = vmatpush3.msk.msra.mxu1 %vm369_vm3, %v357_v8 }
  0xf7   :  { %v509_v60 = vpop.f32.mrb[0].mxu0 }
  0xf8   :  { %v510_v61 = vpop.f32.mrb[1].mxu0 }
  0xf9   :  { %v511_v63 = vadd.f32 %v510_v61, %v509_v60 }
  0xfb   :  { %v176_v0 = vadd.f32 %v511_v63, %v470_v62 }
  0xfc   :  { %v245_v1 = vpop.f32.mrb[0].mxu1 }
  0xfd   :  { %v247_v2 = vpop.f32.mrb[1].mxu1  ;;  %v246_v3 = vadd.f32 %v245_v1, %v176_v0 }
  0xff   :  { %v249_v5 = vmax.f32 %v246_v3, 0.0 }
 0x101   :  { %571 = vmatmul.mubr.msk.f32.vlgmr.msra.gmra.mrb[2].mxu0 %vm272_vm2, %v249_v5 }
 0x1d4   :  { %v342_v10 = vpop.f32.mrb[2].mxu0 }
 0x1d5   :  { %v343_v11 = vadd.f32 %v472_v9, %v342_v10  ;;  %v572_v12 = vpop.f32.mrb[3].mxu0 }
 0x1d7   :  { %v346_v13 = vmax.f32 %v343_v11, 0.0 }
 0x1d9   :  { %596 = vmatmul.mubr.msk.f32.vlgmr.msra.gmra.mrb[2].mxu1 %vm365_vm4, %v346_v13 }
 0x2ac   :  { %v439_v15 = vpop.f32.mrb[2].mxu1 }
 0x2ad   :  { %v440_v16 = vadd.f32 %v474_v14, %v439_v15  ;;  %v597_v17 = vpop.f32.mrb[3].mxu1 }
 0x2af   :  { %v444_v18 = vsel %vm443_vm5, %v440_v16, -inf }
 0x2b0   :  { %445 = vmax.xlane.f32.xlu0 %v444_v18 }
 0x33d   :  { %v446_v19 = vpop.xlane.xlu0 %445 }
 0x33e   :  { %v447_v20 = vsub.f32 %v440_v16, %v446_v19 }
 0x340   :  { %v448_v21 = vmul.f32 1.442695, %v447_v20 }
 0x342   :  { %699 = vpow2.f32 %v448_v21 }
 0x34c   :  { %v700_v22 = vpop.eup %699 }
 0x34d   :  { %v450_v23 = vsel %vm443_vm5, %v700_v22, 0.0 }
 0x34e   :  { %451 = vadd.xlane.f32.xlu0 %v450_v23 }
 0x3db   :  { %v452_v24 = vpop.xlane.xlu0 %451 }
 0x3dc   :  { %701 = vrcp.f32 %v452_v24 }
 0x3e6   :  { %v702_v25 = vpop.eup %701 }
 0x3e7   :  { %v454_v26 = vmul.f32 %v702_v25, %v700_v22 }
 0x3e9   :  { %455 = vst.msk [vmem:[#allocation2] sm:$0x3] %vm443_vm5, %v454_v26 }
 0x3ea   :  { %714 = shalt.err (!%p711_p4)
}
 0x3eb   :  { %s715_s16 = scalar_lea.hbm %s1055_s7, 32 }
 0x3ec   :  { %p716_p5 = scmp.ne.s32.totalorder %s1055_s7, %s715_s16  ;;  %p719_p6 = scmp.lt.u32.totalorder %s715_s16, %s1055_s7 }
 0x3ee   :  { %p721_p7 = pnand %p719_p6, %p716_p5 }
 0x3f0   :  { %724 = shalt.err (!%p721_p7)
}
 0x3f1   :  { %465 = dma.vmem_to_hbm [thread:$0]  %s463_s5, 32, %s1055_s7, [#allocation3]  }
 0x3f2   :  { %725 = dma.done.wait [#allocation3], 32  }
 0x3f3   :  { %726 = vsyncadd [#allocation3], 4294967264 }
 0x3f4   :  { %469 = vsyncpa [#allocation3], 1 }

</bundles_post_ra>
